<compile_context>
chip_gen: v7x
topology: tpu7x:2x2x1
jax: 0.10.0
libtpu: 0.0.40
codegen_flags: <defaults>
</compile_context>

<pallas_src>
import jax
import jax.numpy as jnp
from jax.experimental import pallas as pl
from jax.experimental.pallas import tpu as pltpu

# ---- Hyperparameters implied by the module (small, synthetic) ----
BATCH = 8
CHANNELS = 1
IMG_SIZE = 16
N_CLASSES = 10            # -> img_shape = (C, H, H), not (C, H, 2H)
EMBED = 32                # opt.embedding_size
LABEL_DIM = 100           # opt.use_word_embedding == False
HIDDEN = 512
OUT_PAD = 128             # lane-dense padding of the final N=1 layer

IMG_FLAT = CHANNELS * IMG_SIZE * IMG_SIZE        # 256
D_IN = IMG_FLAT + EMBED                          # 288


def _lrelu(x):
    # LeakyReLU(0.2) in f32 on the VPU.
    return jnp.where(x > 0, x, 0.2 * x)


def discriminator_kernel(img_ref, lab_ref,
                         w1i_ref, w1l_ref, b1_ref,
                         w2_ref, b2_ref,
                         w3_ref, b3_ref,
                         w4_ref, b4_ref,
                         out_ref):
    # Linear-1 on concat([img_flat, emb]) with the embedding layer folded in:
    #   [img | labels@We] @ [[W1_img], [W1_emb]] + b1
    #     == img @ W1_img + labels @ (We @ W1_emb) + (b1 + be @ W1_emb)
    # Weights arrive in bf16; activations are cast to bf16 only at the MXU
    # inputs, accumulation and all element-wise math stay f32.
    img_bf = img_ref[...].astype(jnp.bfloat16)
    lab_bf = lab_ref[...].astype(jnp.bfloat16)
    h = (jnp.dot(img_bf, w1i_ref[...], preferred_element_type=jnp.float32)
         + jnp.dot(lab_bf, w1l_ref[...], preferred_element_type=jnp.float32)
         + b1_ref[...])
    h = _lrelu(h)

    # Dropout(0.4) layers are identity in eval/inference mode.
    h = _lrelu(jnp.dot(h.astype(jnp.bfloat16), w2_ref[...],
                       preferred_element_type=jnp.float32) + b2_ref[...])
    h = _lrelu(jnp.dot(h.astype(jnp.bfloat16), w3_ref[...],
                       preferred_element_type=jnp.float32) + b3_ref[...])

    # Final layer padded to 128 output lanes (unmasked stores); wrapper slices.
    out_ref[...] = (jnp.dot(h.astype(jnp.bfloat16), w4_ref[...],
                            preferred_element_type=jnp.float32) + b4_ref[...])


def _full_spec(shape):
    return pl.BlockSpec(shape, lambda: tuple(0 for _ in shape))


def _fold_params(params):
    """Fold label-embedding into Linear-1, pad the final layer to 128 lanes,
    and cast weight matrices to bf16 (biases stay f32)."""
    (we, be, w1i, w1e, b1, w2, b2, w3, b3, w4, b4) = params

    w1_lab = we @ w1e                      # (100, 512)
    b1_eff = b1 + be @ w1e                 # (1, 512)

    w4_pad = jnp.zeros((HIDDEN, OUT_PAD), jnp.float32).at[:, :1].set(w4)
    b4_pad = jnp.zeros((1, OUT_PAD), jnp.float32).at[:, :1].set(b4)

    bf = jnp.bfloat16
    return (w1i.astype(bf), w1_lab.astype(bf), b1_eff,
            w2.astype(bf), b2, w3.astype(bf), b3,
            w4_pad.astype(bf), b4_pad)


def discriminator_forward(img, labels, params):
    """img: (B, C, H, W) f32, labels: (B, 100) f32 -> (B, 1) f32."""
    B = img.shape[0]
    img_flat = img.reshape(B, -1)          # == torch `img.view(img.size(0), -1)`

    folded = _fold_params(params)
    operands = (img_flat, labels) + folded
    in_specs = [_full_spec(op.shape) for op in operands]

    out_pad = pl.pallas_call(
        discriminator_kernel,
        out_shape=jax.ShapeDtypeStruct((B, OUT_PAD), jnp.float32),
        in_specs=in_specs,
        out_specs=_full_spec((B, OUT_PAD)),
    )(*operands)
    return out_pad[:, :1]                  # free layout plumbing in the wrapper


def init_params(key):
    """Deterministic init mimicking nn.Linear default (uniform ±1/sqrt(fan_in)).
    Weights are stored pre-transposed as (in, out); biases as (1, out)."""
    def linear(k, fan_in, fan_out):
        kw, kb = jax.random.split(k)
        bound = 1.0 / jnp.sqrt(fan_in)
        w = jax.random.uniform(kw, (fan_in, fan_out), jnp.float32, -bound, bound)
        b = jax.random.uniform(kb, (1, fan_out), jnp.float32, -bound, bound)
        return w, b

    k_emb, k1, k2, k3, k4 = jax.random.split(key, 5)
    we, be = linear(k_emb, LABEL_DIM, EMBED)            # label_embedding
    w1, b1 = linear(k1, D_IN, HIDDEN)                   # Linear(D_IN, 512)
    w1i, w1e = w1[:IMG_FLAT], w1[IMG_FLAT:]             # split along concat axis
    w2, b2 = linear(k2, HIDDEN, HIDDEN)
    w3, b3 = linear(k3, HIDDEN, HIDDEN)
    w4, b4 = linear(k4, HIDDEN, 1)
    return (we, be, w1i, w1e, b1, w2, b2, w3, b3, w4, b4)


def reference_forward_f32(img, labels, params):
    """Pure-JAX f32 reference matching the PyTorch module exactly."""
    (we, be, w1i, w1e, b1, w2, b2, w3, b3, w4, b4) = params
    B = img.shape[0]
    x = img.reshape(B, -1)
    emb = labels @ we + be
    d_in = jnp.concatenate([x, emb], axis=-1)
    w1 = jnp.concatenate([w1i, w1e], axis=0)
    h = _lrelu(d_in @ w1 + b1)
    h = _lrelu(h @ w2 + b2)
    h = _lrelu(h @ w3 + b3)
    return h @ w4 + b4


def reference_forward_mixed(img, labels, params):
    """Pure-JAX reference replicating the kernel's bf16-weight / f32-accum math."""
    (w1i, w1l, b1, w2, b2, w3, b3, w4p, b4p) = _fold_params(params)
    B = img.shape[0]
    x = img.reshape(B, -1)

    def mm(a, w):
        return jnp.dot(a.astype(jnp.bfloat16), w, preferred_element_type=jnp.float32)

    h = _lrelu(mm(x, w1i) + mm(labels, w1l) + b1)
    h = _lrelu(mm(h, w2) + b2)
    h = _lrelu(mm(h, w3) + b3)
    return (mm(h, w4p) + b4p)[:, :1]


if __name__ == "__main__":
    key = jax.random.PRNGKey(0)
    k_img, k_lab, k_par = jax.random.split(key, 3)

    img = jax.random.normal(k_img, (BATCH, CHANNELS, IMG_SIZE, IMG_SIZE), jnp.float32)
    labels = jax.random.normal(k_lab, (BATCH, LABEL_DIM), jnp.float32)
    params = init_params(k_par)

    out = discriminator_forward(img, labels, params)
    out = jax.block_until_ready(out)
    assert out.shape == (BATCH, 1)

    # Tight check against a reference that uses the same bf16-weight math.
    ref_mixed = reference_forward_mixed(img, labels, params)
    assert jnp.allclose(out, ref_mixed, atol=2e-3, rtol=2e-3), \
        "mismatch vs precision-matched JAX reference"

    # Loose check against the full-f32 PyTorch-equivalent reference
    # (difference is only bf16 weight/activation rounding).
    ref_f32 = reference_forward_f32(img, labels, params)
    assert jnp.allclose(out, ref_f32, atol=2e-1, rtol=5e-2), \
        "mismatch vs f32 JAX reference beyond bf16 rounding"

    print("KERNEL_OK")
</pallas_src>

<mosaic_0001>
module attributes {stable_mosaic.version = 11 : i64} {
  func.func @discriminator_kernel(%arg0: memref<8x256xf32, #tpu.memory_space<vmem>>, %arg1: memref<8x100xf32, #tpu.memory_space<vmem>>, %arg2: memref<256x512xbf16, #tpu.memory_space<vmem>>, %arg3: memref<100x512xbf16, #tpu.memory_space<vmem>>, %arg4: memref<1x512xf32, #tpu.memory_space<vmem>>, %arg5: memref<512x512xbf16, #tpu.memory_space<vmem>>, %arg6: memref<1x512xf32, #tpu.memory_space<vmem>>, %arg7: memref<512x512xbf16, #tpu.memory_space<vmem>>, %arg8: memref<1x512xf32, #tpu.memory_space<vmem>>, %arg9: memref<512x128xbf16, #tpu.memory_space<vmem>>, %arg10: memref<1x128xf32, #tpu.memory_space<vmem>>, %arg11: memref<8x128xf32, #tpu.memory_space<vmem>>) attributes {dimension_semantics = [], scalar_prefetch = 0 : i64, scratch_operands = 0 : i64, tpu.core_type = #tpu.core_type<tc>} {
    %c0 = arith.constant 0 : index
    %c0_0 = arith.constant 0 : index
    %0 = vector.load %arg0[%c0, %c0_0] : memref<8x256xf32, #tpu.memory_space<vmem>>, vector<8x256xf32>
    %1 = arith.truncf %0 : vector<8x256xf32> to vector<8x256xbf16>
    %c0_1 = arith.constant 0 : index
    %c0_2 = arith.constant 0 : index
    %2 = vector.load %arg1[%c0_1, %c0_2] : memref<8x100xf32, #tpu.memory_space<vmem>>, vector<8x100xf32>
    %3 = arith.truncf %2 : vector<8x100xf32> to vector<8x100xbf16>
    %c0_3 = arith.constant 0 : index
    %c0_4 = arith.constant 0 : index
    %4 = vector.load %arg2[%c0_3, %c0_4] : memref<256x512xbf16, #tpu.memory_space<vmem>>, vector<256x512xbf16>
    %cst = arith.constant dense<0.000000e+00> : vector<8x512xf32>
    %5 = tpu.matmul %1, %4, %cst {dimension_numbers = #tpu.dot_dimension_numbers<[1], [0], [0], [1], [0, 0, 1, 1], [], []>} : vector<8x256xbf16>, vector<256x512xbf16>, vector<8x512xf32> -> vector<8x512xf32>
    %c0_5 = arith.constant 0 : index
    %c0_6 = arith.constant 0 : index
    %6 = vector.load %arg3[%c0_5, %c0_6] : memref<100x512xbf16, #tpu.memory_space<vmem>>, vector<100x512xbf16>
    %cst_7 = arith.constant dense<0.000000e+00> : vector<8x512xf32>
    %7 = tpu.matmul %3, %6, %cst_7 {dimension_numbers = #tpu.dot_dimension_numbers<[1], [0], [0], [1], [0, 0, 1, 1], [], []>} : vector<8x100xbf16>, vector<100x512xbf16>, vector<8x512xf32> -> vector<8x512xf32>
    %8 = arith.addf %5, %7 : vector<8x512xf32>
    %c0_8 = arith.constant 0 : index
    %c0_9 = arith.constant 0 : index
    %9 = vector.load %arg4[%c0_8, %c0_9] : memref<1x512xf32, #tpu.memory_space<vmem>>, vector<1x512xf32>
    %10 = vector.broadcast %9 : vector<1x512xf32> to vector<8x512xf32>
    %11 = arith.addf %8, %10 : vector<8x512xf32>
    %cst_10 = arith.constant 0.000000e+00 : f32
    %12 = vector.broadcast %cst_10 : f32 to vector<8x512xf32>
    %13 = arith.cmpf ogt, %11, %12 : vector<8x512xf32>
    %cst_11 = arith.constant 2.000000e-01 : f32
    %14 = vector.broadcast %cst_11 : f32 to vector<8x512xf32>
    %15 = arith.mulf %14, %11 : vector<8x512xf32>
    %16 = arith.select %13, %11, %15 : vector<8x512xi1>, vector<8x512xf32>
    %17 = arith.truncf %16 : vector<8x512xf32> to vector<8x512xbf16>
    %c0_12 = arith.constant 0 : index
    %c0_13 = arith.constant 0 : index
    %18 = vector.load %arg5[%c0_12, %c0_13] : memref<512x512xbf16, #tpu.memory_space<vmem>>, vector<512x512xbf16>
    %cst_14 = arith.constant dense<0.000000e+00> : vector<8x512xf32>
    %19 = tpu.matmul %17, %18, %cst_14 {dimension_numbers = #tpu.dot_dimension_numbers<[1], [0], [0], [1], [0, 0, 1, 1], [], []>} : vector<8x512xbf16>, vector<512x512xbf16>, vector<8x512xf32> -> vector<8x512xf32>
    %c0_15 = arith.constant 0 : index
    %c0_16 = arith.constant 0 : index
    %20 = vector.load %arg6[%c0_15, %c0_16] : memref<1x512xf32, #tpu.memory_space<vmem>>, vector<1x512xf32>
    %21 = vector.broadcast %20 : vector<1x512xf32> to vector<8x512xf32>
    %22 = arith.addf %19, %21 : vector<8x512xf32>
    %cst_17 = arith.constant 0.000000e+00 : f32
    %23 = vector.broadcast %cst_17 : f32 to vector<8x512xf32>
    %24 = arith.cmpf ogt, %22, %23 : vector<8x512xf32>
    %cst_18 = arith.constant 2.000000e-01 : f32
    %25 = vector.broadcast %cst_18 : f32 to vector<8x512xf32>
    %26 = arith.mulf %25, %22 : vector<8x512xf32>
    %27 = arith.select %24, %22, %26 : vector<8x512xi1>, vector<8x512xf32>
    %28 = arith.truncf %27 : vector<8x512xf32> to vector<8x512xbf16>
    %c0_19 = arith.constant 0 : index
    %c0_20 = arith.constant 0 : index
    %29 = vector.load %arg7[%c0_19, %c0_20] : memref<512x512xbf16, #tpu.memory_space<vmem>>, vector<512x512xbf16>
    %cst_21 = arith.constant dense<0.000000e+00> : vector<8x512xf32>
    %30 = tpu.matmul %28, %29, %cst_21 {dimension_numbers = #tpu.dot_dimension_numbers<[1], [0], [0], [1], [0, 0, 1, 1], [], []>} : vector<8x512xbf16>, vector<512x512xbf16>, vector<8x512xf32> -> vector<8x512xf32>
    %c0_22 = arith.constant 0 : index
    %c0_23 = arith.constant 0 : index
    %31 = vector.load %arg8[%c0_22, %c0_23] : memref<1x512xf32, #tpu.memory_space<vmem>>, vector<1x512xf32>
    %32 = vector.broadcast %31 : vector<1x512xf32> to vector<8x512xf32>
    %33 = arith.addf %30, %32 : vector<8x512xf32>
    %cst_24 = arith.constant 0.000000e+00 : f32
    %34 = vector.broadcast %cst_24 : f32 to vector<8x512xf32>
    %35 = arith.cmpf ogt, %33, %34 : vector<8x512xf32>
    %cst_25 = arith.constant 2.000000e-01 : f32
    %36 = vector.broadcast %cst_25 : f32 to vector<8x512xf32>
    %37 = arith.mulf %36, %33 : vector<8x512xf32>
    %38 = arith.select %35, %33, %37 : vector<8x512xi1>, vector<8x512xf32>
    %39 = arith.truncf %38 : vector<8x512xf32> to vector<8x512xbf16>
    %c0_26 = arith.constant 0 : index
    %c0_27 = arith.constant 0 : index
    %40 = vector.load %arg9[%c0_26, %c0_27] : memref<512x128xbf16, #tpu.memory_space<vmem>>, vector<512x128xbf16>
    %cst_28 = arith.constant dense<0.000000e+00> : vector<8x128xf32>
    %41 = tpu.matmul %39, %40, %cst_28 {dimension_numbers = #tpu.dot_dimension_numbers<[1], [0], [0], [1], [0, 0, 1, 1], [], []>} : vector<8x512xbf16>, vector<512x128xbf16>, vector<8x128xf32> -> vector<8x128xf32>
    %c0_29 = arith.constant 0 : index
    %c0_30 = arith.constant 0 : index
    %42 = vector.load %arg10[%c0_29, %c0_30] : memref<1x128xf32, #tpu.memory_space<vmem>>, vector<1x128xf32>
    %43 = vector.broadcast %42 : vector<1x128xf32> to vector<8x128xf32>
    %44 = arith.addf %41, %43 : vector<8x128xf32>
    %c0_31 = arith.constant 0 : index
    %c0_32 = arith.constant 0 : index
    %45 = vector.load %arg11[%c0_31, %c0_32] : memref<8x128xf32, #tpu.memory_space<vmem>>, vector<8x128xf32>
    tpu.vector_store %arg11[%c0_31, %c0_32], %44 {strides = array<i32>} : memref<8x128xf32, #tpu.memory_space<vmem>>, vector<8x128xf32>,
    return
  }
}

</mosaic_0001>

<bundles_post_ra>
// kernel: tpu_custom_call.1
= control target key start
LH: loop header
LB: loop body
LE: loop exit
PB: predicated region body
PF: predicated region fallthrough
CT: control target
= control target key end

     0   :  { %16 = vsyncpa [#allocation3], 0  ;;  %s4633_s0 = inlined_call_operand.hbm [shape: f32[8,256], index: 0, kind: input, shape index: {}]   ;;  %s4634_s1 = inlined_call_operand.hbm [shape: f32[8,100], index: 1, kind: input, shape index: {}]   ;;  %s4635_s2 = inlined_call_operand.hbm [shape: bf16[256,512], index: 2, kind: input, shape index: {}]   ;;  %s4636_s3 = inlined_call_operand.hbm [shape: bf16[100,512], index: 3, kind: input, shape index: {}]   ;;  %s4637_s4 = inlined_call_operand.vmem [shape: f32[1,512], index: 4, kind: input, shape index: {}]   ;;  %s4638_s5 = inlined_call_operand.hbm [shape: bf16[512,512], index: 5, kind: input, shape index: {}]   ;;  %s4639_s6 = inlined_call_operand.vmem [shape: f32[1,512], index: 6, kind: input, shape index: {}]   ;;  %s4640_s7 = inlined_call_operand.hbm [shape: bf16[512,512], index: 7, kind: input, shape index: {}]   ;;  %s4641_s8 = inlined_call_operand.vmem [shape: f32[1,512], index: 8, kind: input, shape index: {}]   ;;  %s4642_s9 = inlined_call_operand.hbm [shape: bf16[512,128], index: 9, kind: input, shape index: {}]   ;;  %s4643_s10 = inlined_call_operand.vmem [shape: f32[1,128], index: 10, kind: input, shape index: {}]   ;;  %s4644_s11 = inlined_call_operand.hbm [shape: f32[8,128], index: 11, kind: output, shape index: {}]  }
   0x1   :  { %17 = vsyncpa [#allocation6], 0 }
   0x2   :  { %18 = vsyncpa [#allocation9], 0 }
   0x3   :  { %19 = vsyncpa [#allocation12], 0 }
   0x4   :  { %20 = vsyncpa [#allocation4], 0  ;;  %s4406_s17 = smov [#allocation5]   ;;  %s4220_s21 = scalar_lea.hbm %s4634_s1, 128 }
   0x5   :  { %s37_s18 = sshll.u32 %s4406_s17, 4  ;;  %p4221_p0 = scmp.ne.s32.totalorder %s4634_s1, %s4220_s21  ;;  %s38_s18 = int_to_ptr.vmem [resolvable:$true] %s37_s18 }
   0x6   :  { %p4224_p1 = scmp.lt.u32.totalorder %s4220_s21, %s4634_s1 }
   0x8   :  { %p4226_p2 = pnand %p4224_p1, %p4221_p0 }
   0xa   :  { %4229 = shalt.err (!%p4226_p2)
}
   0xb   :  { %s4230_s26 = scalar_lea.vmem %s38_s18, 128  ;;  %p4235_p4 = scmp.lt.s32.totalorder %s38_s18, %s38_s18 }
   0xc   :  { %p4231_p3 = scmp.ne.s32.totalorder %s38_s18, %s4230_s26  ;;  %p4236_p5 = scmp.lt.s32.totalorder %s4230_s26, %s4230_s26 }
   0xe   :  { %p4237_p6 = por %p4236_p5, %p4235_p4 }
  0x10   :  { %p4238_p7 = pnand %p4237_p6, %p4231_p3 }
  0x12   :  { %4241 = shalt.err (!%p4238_p7)
}
  0x13   :  { %40 = dma.hbm_to_vmem [thread:$0]  %s4634_s1, 128, %s38_s18, [#allocation6]  }
  0x14   :  { %s4407_s29 = smov [#allocation8]   ;;  %s4408_s12 = smov [#allocation11]  }
  0x15   :  { %s58_s30 = sshll.u32 %s4407_s29, 4  ;;  %s86_s13 = sshll.u32 %s4408_s12, 4  ;;  %s59_s30 = int_to_ptr.vmem [resolvable:$true] %s58_s30  ;;  %s87_s13 = int_to_ptr.vmem [resolvable:$true] %s86_s13 }
  0x16   :  { %s4242_s16 = scalar_lea.hbm %s4636_s3, 3328 }
  0x17   :  { %p4243_p8 = scmp.ne.s32.totalorder %s4636_s3, %s4242_s16  ;;  %p4246_p9 = scmp.lt.u32.totalorder %s4242_s16, %s4636_s3 }
  0x19   :  { %p4248_p10 = pnand %p4246_p9, %p4243_p8 }
  0x1b   :  { %4251 = shalt.err (!%p4248_p10)
}
  0x1c   :  { %s4252_s1 = scalar_lea.vmem %s59_s30, 3328  ;;  %p4257_p12 = scmp.lt.s32.totalorder %s59_s30, %s59_s30 }
  0x1d   :  { %p4253_p11 = scmp.ne.s32.totalorder %s59_s30, %s4252_s1  ;;  %p4258_p13 = scmp.lt.s32.totalorder %s4252_s1, %s4252_s1 }
  0x1f   :  { %p4259_p0 = por %p4258_p13, %p4257_p12 }
  0x21   :  { %p4260_p1 = pnand %p4259_p0, %p4253_p11 }
  0x23   :  { %4263 = shalt.err (!%p4260_p1)
}
  0x24   :  { %s4409_s18 = smov 256   ;;  %s4410_s22 = smov 16  }
  0x25   :  { %64 = dma.hbm_to_vmem [thread:$0]  %s4636_s3, 3328, %s59_s30, [#allocation9], %s4409_s18, %s4409_s18, %s4410_s22  }
  0x26   :  { %s4264_s27 = scalar_lea.hbm %s4640_s7, 16384 }
  0x27   :  { %p4265_p2 = scmp.ne.s32.totalorder %s4640_s7, %s4264_s27  ;;  %p4268_p3 = scmp.lt.u32.totalorder %s4264_s27, %s4640_s7 }
  0x29   :  { %p4270_p4 = pnand %p4268_p3, %p4265_p2 }
  0x2b   :  { %4273 = shalt.err (!%p4270_p4)
}
  0x2c   :  { %s4274_s15 = scalar_lea.vmem %s87_s13, 16384  ;;  %p4279_p6 = scmp.lt.s32.totalorder %s87_s13, %s87_s13 }
  0x2d   :  { %p4275_p5 = scmp.ne.s32.totalorder %s87_s13, %s4274_s15  ;;  %p4280_p7 = scmp.lt.s32.totalorder %s4274_s15, %s4274_s15 }
  0x2f   :  { %p4281_p8 = por %p4280_p7, %p4279_p6 }
  0x31   :  { %p4282_p9 = pnand %p4281_p8, %p4275_p5 }
  0x33   :  { %4285 = shalt.err (!%p4282_p9)
}
  0x34   :  { %92 = dma.hbm_to_vmem [thread:$0]  %s4640_s7, 16384, %s87_s13, [#allocation12], %s4409_s18, %s4409_s18, %s4410_s22  }
  0x35   :  { %s4411_s16 = smov [#allocation2]   ;;  %s4412_s19 = smov [#allocation7]  }
  0x36   :  { %s27_s17 = sshll.u32 %s4411_s16, 4  ;;  %s46_s20 = sshll.u32 %s4412_s19, 4  ;;  %s28_s17 = int_to_ptr.vmem [resolvable:$true] %s27_s17  ;;  %s47_s20 = int_to_ptr.vmem [resolvable:$true] %s46_s20 }
  0x37   :  { %s4286_s23 = scalar_lea.hbm %s4633_s0, 256 }
  0x38   :  { %p4287_p10 = scmp.ne.s32.totalorder %s4633_s0, %s4286_s23  ;;  %p4290_p11 = scmp.lt.u32.totalorder %s4286_s23, %s4633_s0 }
  0x3a   :  { %p4292_p12 = pnand %p4290_p11, %p4287_p10 }
  0x3c   :  { %4295 = shalt.err (!%p4292_p12)
}
  0x3d   :  { %s4296_s7 = scalar_lea.vmem %s28_s17, 256  ;;  %p4301_p0 = scmp.lt.s32.totalorder %s28_s17, %s28_s17 }
  0x3e   :  { %p4297_p13 = scmp.ne.s32.totalorder %s28_s17, %s4296_s7  ;;  %p4302_p1 = scmp.lt.s32.totalorder %s4296_s7, %s4296_s7 }
  0x40   :  { %p4303_p2 = por %p4302_p1, %p4301_p0 }
  0x42   :  { %p4304_p3 = pnand %p4303_p2, %p4297_p13 }
  0x44   :  { %4307 = shalt.err (!%p4304_p3)
}
  0x45   :  { %30 = dma.hbm_to_vmem [thread:$0]  %s4633_s0, 256, %s28_s17, [#allocation3]  }
  0x46   :  { %s4308_s14 = scalar_lea.hbm %s4635_s2, 8192 }
  0x47   :  { %p4309_p4 = scmp.ne.s32.totalorder %s4635_s2, %s4308_s14  ;;  %p4312_p5 = scmp.lt.u32.totalorder %s4308_s14, %s4635_s2 }
  0x49   :  { %p4314_p6 = pnand %p4312_p5, %p4309_p4 }
  0x4b   :  { %4317 = shalt.err (!%p4314_p6)
}
  0x4c   :  { %s4318_s19 = scalar_lea.vmem %s47_s20, 8192  ;;  %p4323_p8 = scmp.lt.s32.totalorder %s47_s20, %s47_s20 }
  0x4d   :  { %p4319_p7 = scmp.ne.s32.totalorder %s47_s20, %s4318_s19  ;;  %p4324_p9 = scmp.lt.s32.totalorder %s4318_s19, %s4318_s19 }
  0x4f   :  { %p4325_p10 = por %p4324_p9, %p4323_p8 }
  0x51   :  { %p4326_p11 = pnand %p4325_p10, %p4319_p7 }
  0x53   :  { %4329 = shalt.err (!%p4326_p11)
}
  0x54   :  { %52 = dma.hbm_to_vmem [thread:$0]  %s4635_s2, 8192, %s47_s20, [#allocation6], %s4409_s18, %s4409_s18, %s4410_s22  }
  0x55   :  { %s4413_s21 = smov [#allocation10]   ;;  %s4414_s23 = smov [#allocation13]  }
  0x56   :  { %s72_s1 = sshll.u32 %s4413_s21, 4  ;;  %s100_s24 = sshll.u32 %s4414_s23, 4  ;;  %s73_s1 = int_to_ptr.vmem [resolvable:$true] %s72_s1  ;;  %s101_s24 = int_to_ptr.vmem [resolvable:$true] %s100_s24 }
  0x57   :  { %s4330_s27 = scalar_lea.hbm %s4638_s5, 16384 }
  0x58   :  { %p4331_p12 = scmp.ne.s32.totalorder %s4638_s5, %s4330_s27  ;;  %p4334_p13 = scmp.lt.u32.totalorder %s4330_s27, %s4638_s5 }
  0x5a   :  { %p4336_p0 = pnand %p4334_p13, %p4331_p12 }
  0x5c   :  { %4339 = shalt.err (!%p4336_p0)
}
  0x5d   :  { %s4340_s2 = scalar_lea.vmem %s73_s1, 16384  ;;  %p4345_p2 = scmp.lt.s32.totalorder %s73_s1, %s73_s1 }
  0x5e   :  { %p4341_p1 = scmp.ne.s32.totalorder %s73_s1, %s4340_s2  ;;  %p4346_p3 = scmp.lt.s32.totalorder %s4340_s2, %s4340_s2 }
  0x60   :  { %p4347_p4 = por %p4346_p3, %p4345_p2 }
  0x62   :  { %p4348_p5 = pnand %p4347_p4, %p4341_p1 }
  0x64   :  { %4351 = shalt.err (!%p4348_p5)
}
  0x65   :  { %78 = dma.hbm_to_vmem [thread:$0]  %s4638_s5, 16384, %s73_s1, [#allocation9], %s4409_s18, %s4409_s18, %s4410_s22  }
  0x66   :  { %s4352_s3 = scalar_lea.hbm %s4642_s9, 4096 }
  0x67   :  { %p4353_p6 = scmp.ne.s32.totalorder %s4642_s9, %s4352_s3  ;;  %p4356_p7 = scmp.lt.u32.totalorder %s4352_s3, %s4642_s9 }
  0x69   :  { %p4358_p8 = pnand %p4356_p7, %p4353_p6 }
  0x6b   :  { %4361 = shalt.err (!%p4358_p8)
}
  0x6c   :  { %s4362_s17 = scalar_lea.vmem %s101_s24, 4096  ;;  %p4367_p10 = scmp.lt.s32.totalorder %s101_s24, %s101_s24 }
  0x6d   :  { %p4363_p9 = scmp.ne.s32.totalorder %s101_s24, %s4362_s17  ;;  %p4368_p11 = scmp.lt.s32.totalorder %s4362_s17, %s4362_s17 }
  0x6f   :  { %p4369_p12 = por %p4368_p11, %p4367_p10 }
  0x71   :  { %p4370_p13 = pnand %p4369_p12, %p4363_p9 }
  0x73   :  { %4373 = shalt.err (!%p4370_p13)
}
  0x74   :  { %s4415_s5 = smov 64   ;;  %s4416_s18 = smov 4  }
  0x75   :  { %106 = dma.hbm_to_vmem [thread:$0]  %s4642_s9, 4096, %s101_s24, [#allocation12], %s4415_s5, %s4415_s5, %s4416_s18  }
  0x76   :  { %4396 = dma.done.wait [#allocation3], 256  }
  0x77   :  { %4397 = vsyncadd [#allocation3], 4294967040 }
  0x78   :  { %4398 = dma.done.wait [#allocation6], 8320  }
  0x79   :  { %4399 = vsyncadd [#allocation6], 4294958976 }
  0x7a   :  { %4400 = dma.done.wait [#allocation9], 19712  }
  0x7b   :  { %4401 = vsyncadd [#allocation9], 4294947584 }
  0x7c   :  { %4402 = dma.done.wait [#allocation12], 20480  }
  0x7d   :  { %4403 = vsyncadd [#allocation12], 4294946816  ;;  %v4417_v0 = vmov 0   ;;  %v3668_v1 = vld [vmem:[#allocation8 + $0x4] ss:$16 sps:$4 sm:$0xff]   ;;  %vm361_vm0 = vcmask 1041408  }
  0x7e   :  { %406 = vmatprep.mubr.bf16.mxu0 %v4417_v0  ;;  %447 = vmatprep.mubr.bf16.mxu1 %v4417_v0  ;;  %v3670_v2 = vld [vmem:[#allocation8 + $0xc] ss:$16 sps:$4 sm:$0xff]   ;;  %v3672_v3 = vld [vmem:[#allocation8] ss:$16 sps:$4 sm:$0xff]   ;;  %v3673_v4 = vld [vmem:[#allocation8 + $0x8] ss:$16 sps:$4 sm:$0xff]  }
  0x7f   :  { %374 = vmatprep.subr.bf16.mxu0 %v3668_v1  ;;  %415 = vmatprep.subr.bf16.mxu1 %v3670_v2  ;;  %v3674_v5 = vld [vmem:[#allocation8 + $0x24] ss:$16 sps:$4 sm:$0xff]   ;;  %v3676_v6 = vld [vmem:[#allocation8 + $0x2c] ss:$16 sps:$4 sm:$0xff]   ;;  %v3678_v7 = vld [vmem:[#allocation8 + $0x20] ss:$16 sps:$4 sm:$0xff]  }
  0x80   :  { %375 = vmatpush1.bf16.msra.mxu0 %v3672_v3  ;;  %416 = vmatpush1.bf16.msra.mxu1 %v3673_v4  ;;  %v3679_v8 = vld [vmem:[#allocation8 + $0x28] ss:$16 sps:$4 sm:$0xff]   ;;  %v3680_v9 = vld [vmem:[#allocation8 + $0x44] ss:$16 sps:$4 sm:$0xff]   ;;  %v3682_v10 = vld [vmem:[#allocation8 + $0x4c] ss:$16 sps:$4 sm:$0xff]  }
  0x81   :  { %376 = vmatprep.subr.bf16.mxu0 %v3674_v5  ;;  %417 = vmatprep.subr.bf16.mxu1 %v3676_v6  ;;  %v3684_v11 = vld [vmem:[#allocation8 + $0x40] ss:$16 sps:$4 sm:$0xff]   ;;  %v3685_v12 = vld [vmem:[#allocation8 + $0x48] ss:$16 sps:$4 sm:$0xff]   ;;  %v3686_v13 = vld [vmem:[#allocation8 + $0x64] ss:$16 sps:$4 sm:$0xff]  }
  0x82   :  { %v3688_v14 = vld [vmem:[#allocation8 + $0x6c] ss:$16 sps:$4 sm:$0xff]   ;;  %v3690_v15 = vld [vmem:[#allocation8 + $0x60] ss:$16 sps:$4 sm:$0xff]   ;;  %v3691_v16 = vld [vmem:[#allocation8 + $0x68] ss:$16 sps:$4 sm:$0xff]  }
  0x83   :  { %v3692_v17 = vld [vmem:[#allocation8 + $0x84] ss:$16 sps:$4 sm:$0xff]   ;;  %v3694_v18 = vld [vmem:[#allocation8 + $0x8c] ss:$16 sps:$4 sm:$0xff]   ;;  %v3696_v19 = vld [vmem:[#allocation8 + $0x80] ss:$16 sps:$4 sm:$0xff]  }
  0x84   :  { %377 = vmatpush1.bf16.msra.mxu0 %v3678_v7  ;;  %418 = vmatpush1.bf16.msra.mxu1 %v3679_v8  ;;  %v3697_v20 = vld [vmem:[#allocation8 + $0x88] ss:$16 sps:$4 sm:$0xff]   ;;  %v3698_v21 = vld [vmem:[#allocation8 + $0xa4] ss:$16 sps:$4 sm:$0xff]   ;;  %v3700_v22 = vld [vmem:[#allocation8 + $0xac] ss:$16 sps:$4 sm:$0xff]  }
  0x85   :  { %378 = vmatprep.subr.bf16.mxu0 %v3680_v9  ;;  %419 = vmatprep.subr.bf16.mxu1 %v3682_v10  ;;  %v225_v23 = vld [vmem:[#allocation8 + $0xc0] sm:$0x33]  ;;  %v226_v24 = vld [vmem:[#allocation8 + $0xc8] sm:$0x33]  ;;  %v135_v31 = vld [vmem:[#allocation5] sm:$0xff]  ;;  %vm357_vm1 = vcmask 818176  }
  0x86   :  { %v3702_v25 = vld [vmem:[#allocation8 + $0xa0] ss:$16 sps:$4 sm:$0xff]   ;;  %v3703_v26 = vld [vmem:[#allocation8 + $0xa8] ss:$16 sps:$4 sm:$0xff]   ;;  %v3227_v27 = vcombine.high %v225_v23, %v225_v23  ;;  %v3229_v28 = vcombine.high %v226_v24, %v226_v24  ;;  %v3226_v29 = vcombine.low %v225_v23, %v225_v23  ;;  %v3228_v30 = vcombine.low %v226_v24, %v226_v24  ;;  %v3710_v32 = vld [vmem:[#allocation7 + $0x4] ss:$16 sps:$4 sm:$0xff]  }
  0x87   :  { %v3713_v35 = vld [vmem:[#allocation7 + $0xc] ss:$16 sps:$4 sm:$0xff]   ;;  %v136_v36 = vpack.c.bf16 %v135_v31, %v135_v31  ;;  %v3708_v37 = vld [vmem:[#allocation7] ss:$16 sps:$4 sm:$0xff]   ;;  %v3711_v38 = vld [vmem:[#allocation7 + $0x8] ss:$16 sps:$4 sm:$0xff]  }
  0x88   :  { %379 = vmatpush1.bf16.msra.mxu0 %v3684_v11  ;;  %420 = vmatpush1.bf16.msra.mxu1 %v3685_v12  ;;  %v363_v33 = vsel %vm361_vm0, %v3226_v29, 0  ;;  %v369_v34 = vsel %vm361_vm0, %v3228_v30, 0  ;;  %v3716_v39 = vld [vmem:[#allocation7 + $0x24] ss:$16 sps:$4 sm:$0xff]   ;;  %v3719_v40 = vld [vmem:[#allocation7 + $0x2c] ss:$16 sps:$4 sm:$0xff]  }
  0x89   :  { %380 = vmatprep.subr.bf16.mxu0 %v3686_v13  ;;  %421 = vmatprep.subr.bf16.mxu1 %v3688_v14  ;;  %v3714_v41 = vld [vmem:[#allocation7 + $0x20] ss:$16 sps:$4 sm:$0xff]   ;;  %v3717_v42 = vld [vmem:[#allocation7 + $0x28] ss:$16 sps:$4 sm:$0xff]   ;;  %v3722_v43 = vld [vmem:[#allocation7 + $0x44] ss:$16 sps:$4 sm:$0xff]  }
  0x8a   :  { %v3725_v44 = vld [vmem:[#allocation7 + $0x4c] ss:$16 sps:$4 sm:$0xff]   ;;  %v3720_v45 = vld [vmem:[#allocation7 + $0x40] ss:$16 sps:$4 sm:$0xff]   ;;  %v3723_v46 = vld [vmem:[#allocation7 + $0x48] ss:$16 sps:$4 sm:$0xff]  }
  0x8b   :  { %v3728_v47 = vld [vmem:[#allocation7 + $0x64] ss:$16 sps:$4 sm:$0xff]   ;;  %v3731_v48 = vld [vmem:[#allocation7 + $0x6c] ss:$16 sps:$4 sm:$0xff]   ;;  %v3726_v49 = vld [vmem:[#allocation7 + $0x60] ss:$16 sps:$4 sm:$0xff]  }
  0x8c   :  { %381 = vmatpush1.bf16.msra.mxu0 %v3690_v15  ;;  %422 = vmatpush1.bf16.msra.mxu1 %v3691_v16  ;;  %v3729_v50 = vld [vmem:[#allocation7 + $0x68] ss:$16 sps:$4 sm:$0xff]   ;;  %v3734_v51 = vld [vmem:[#allocation7 + $0x84] ss:$16 sps:$4 sm:$0xff]   ;;  %v3737_v52 = vld [vmem:[#allocation7 + $0x8c] ss:$16 sps:$4 sm:$0xff]  }
  0x8d   :  { %382 = vmatprep.subr.bf16.mxu0 %v3692_v17  ;;  %423 = vmatprep.subr.bf16.mxu1 %v3694_v18  ;;  %v3732_v53 = vld [vmem:[#allocation7 + $0x80] ss:$16 sps:$4 sm:$0xff]   ;;  %v3735_v54 = vld [vmem:[#allocation7 + $0x88] ss:$16 sps:$4 sm:$0xff]   ;;  %v3740_v55 = vld [vmem:[#allocation7 + $0xa4] ss:$16 sps:$4 sm:$0xff]  }
  0x8e   :  { %v3743_v56 = vld [vmem:[#allocation7 + $0xac] ss:$16 sps:$4 sm:$0xff]   ;;  %v3738_v57 = vld [vmem:[#allocation7 + $0xa0] ss:$16 sps:$4 sm:$0xff]   ;;  %v3741_v58 = vld [vmem:[#allocation7 + $0xa8] ss:$16 sps:$4 sm:$0xff]  }
  0x8f   :  { %v3746_v59 = vld [vmem:[#allocation7 + $0xc4] ss:$16 sps:$4 sm:$0xff]   ;;  %v3749_v60 = vld [vmem:[#allocation7 + $0xcc] ss:$16 sps:$4 sm:$0xff]   ;;  %v3744_v61 = vld [vmem:[#allocation7 + $0xc0] ss:$16 sps:$4 sm:$0xff]  }
  0x90   :  { %383 = vmatpush1.bf16.msra.mxu0 %v3696_v19  ;;  %424 = vmatpush1.bf16.msra.mxu1 %v3697_v20  ;;  %v3747_v62 = vld [vmem:[#allocation7 + $0xc8] ss:$16 sps:$4 sm:$0xff]   ;;  %v3752_v63 = vld [vmem:[#allocation7 + $0xe4] ss:$16 sps:$4 sm:$0xff]   ;;  %v3755_v0 = vld [vmem:[#allocation7 + $0xec] ss:$16 sps:$4 sm:$0xff]  }
  0x91   :  { %384 = vmatprep.subr.bf16.mxu0 %v3698_v21  ;;  %425 = vmatprep.subr.bf16.mxu1 %v3700_v22  ;;  %v3750_v1 = vld [vmem:[#allocation7 + $0xe0] ss:$16 sps:$4 sm:$0xff]   ;;  %v3753_v2 = vld [vmem:[#allocation7 + $0xe8] ss:$16 sps:$4 sm:$0xff]   ;;  %v3758_v3 = vld [vmem:[#allocation7 + $0x104] ss:$16 sps:$4 sm:$0xff]  }
  0x92   :  { %v3761_v4 = vld [vmem:[#allocation7 + $0x10c] ss:$16 sps:$4 sm:$0xff]   ;;  %v3756_v5 = vld [vmem:[#allocation7 + $0x100] ss:$16 sps:$4 sm:$0xff]   ;;  %v3759_v6 = vld [vmem:[#allocation7 + $0x108] ss:$16 sps:$4 sm:$0xff]  }
  0x93   :  { %v3764_v7 = vld [vmem:[#allocation7 + $0x124] ss:$16 sps:$4 sm:$0xff]   ;;  %v3767_v9 = vld [vmem:[#allocation7 + $0x12c] ss:$16 sps:$4 sm:$0xff]   ;;  %v3762_v11 = vld [vmem:[#allocation7 + $0x120] ss:$16 sps:$4 sm:$0xff]  }
  0x94   :  { %385 = vmatpush1.bf16.msra.mxu0 %v3702_v25  ;;  %426 = vmatpush1.bf16.msra.mxu1 %v3703_v26  ;;  %v132_v8 = vld [vmem:[#allocation2 + $0x8] sm:$0xff]  ;;  %v3765_v12 = vld [vmem:[#allocation7 + $0x128] ss:$16 sps:$4 sm:$0xff]   ;;  %v3773_v14 = vld [vmem:[#allocation7 + $0x14c] ss:$16 sps:$4 sm:$0xff]   ;;  %s4418_s26 = smov [#allocation14]  }
  0x95   :  { %3230 = vmatprep.subr.msk.bf16.mxu0 %vm361_vm0, %v3227_v27  ;;  %3232 = vmatprep.subr.msk.bf16.mxu1 %vm361_vm0, %v3229_v28  ;;  %v134_v10 = vpack.c.bf16 %v132_v8, %v132_v8  ;;  %v3770_v13 = vld [vmem:[#allocation7 + $0x144] ss:$16 sps:$4 sm:$0xff]   ;;  %v3768_v15 = vld [vmem:[#allocation7 + $0x140] ss:$16 sps:$4 sm:$0xff]   ;;  %v3771_v16 = vld [vmem:[#allocation7 + $0x148] ss:$16 sps:$4 sm:$0xff]  }
  0x96   :  { %v3776_v17 = vld [vmem:[#allocation7 + $0x164] ss:$16 sps:$4 sm:$0xff]   ;;  %v3779_v18 = vld [vmem:[#allocation7 + $0x16c] ss:$16 sps:$4 sm:$0xff]   ;;  %v3774_v19 = vld [vmem:[#allocation7 + $0x160] ss:$16 sps:$4 sm:$0xff]  }
  0x97   :  { %v3777_v20 = vld [vmem:[#allocation7 + $0x168] ss:$16 sps:$4 sm:$0xff]   ;;  %v3782_v21 = vld [vmem:[#allocation7 + $0x184] ss:$16 sps:$4 sm:$0xff]   ;;  %v3785_v22 = vld [vmem:[#allocation7 + $0x18c] ss:$16 sps:$4 sm:$0xff]  }
  0x98   :  { %387 = vmatpush1.bf16.msra.mxu0 %v363_v33  ;;  %428 = vmatpush1.bf16.msra.mxu1 %v369_v34  ;;  %v3780_v23 = vld [vmem:[#allocation7 + $0x180] ss:$16 sps:$4 sm:$0xff]   ;;  %v3783_v24 = vld [vmem:[#allocation7 + $0x188] ss:$16 sps:$4 sm:$0xff]   ;;  %v3788_v25 = vld [vmem:[#allocation7 + $0x1a4] ss:$16 sps:$4 sm:$0xff]  }
  0x99   :  { %776 = vmatprep.subr.bf16.mxu0 %v3710_v32  ;;  %817 = vmatprep.subr.bf16.mxu1 %v3713_v35  ;;  %v3791_v26 = vld [vmem:[#allocation7 + $0x1ac] ss:$16 sps:$4 sm:$0xff]   ;;  %v3786_v27 = vld [vmem:[#allocation7 + $0x1a0] ss:$16 sps:$4 sm:$0xff]   ;;  %v3789_v28 = vld [vmem:[#allocation7 + $0x1a8] ss:$16 sps:$4 sm:$0xff]  }
  0x9a   :  { %v3794_v29 = vld [vmem:[#allocation7 + $0x1c4] ss:$16 sps:$4 sm:$0xff]   ;;  %v3797_v30 = vld [vmem:[#allocation7 + $0x1cc] ss:$16 sps:$4 sm:$0xff]   ;;  %v3792_v31 = vld [vmem:[#allocation7 + $0x1c0] ss:$16 sps:$4 sm:$0xff]  }
  0x9b   :  { %3231 = vmatmul.mubr.msk.bf16.vlgmr.msra.gmra.mrb[0].mxu0 %vm357_vm1, %v136_v36  ;;  %3233 = vmatmul.mubr.msk.bf16.vlgmr.msra.gmra.mrb[0].mxu1 %vm357_vm1, %v136_v36  ;;  %v3795_v32 = vld [vmem:[#allocation7 + $0x1c8] ss:$16 sps:$4 sm:$0xff]   ;;  %v3800_v33 = vld [vmem:[#allocation7 + $0x1e4] ss:$16 sps:$4 sm:$0xff]   ;;  %v3803_v34 = vld [vmem:[#allocation7 + $0x1ec] ss:$16 sps:$4 sm:$0xff]  }
  0x9c   :  { %777 = vmatpush1.bf16.msra.mxu0 %v3708_v37  ;;  %818 = vmatpush1.bf16.msra.mxu1 %v3711_v38  ;;  %v3798_v35 = vld [vmem:[#allocation7 + $0x1e0] ss:$16 sps:$4 sm:$0xff]   ;;  %v3801_v36 = vld [vmem:[#allocation7 + $0x1e8] ss:$16 sps:$4 sm:$0xff]   ;;  %v3857_v8 = vld [vmem:[#allocation10 + $0x10c] ss:$16 sps:$4 sm:$0xff]  }
  0x9d   :  { %778 = vmatprep.subr.bf16.mxu0 %v3716_v39  ;;  %819 = vmatprep.subr.bf16.mxu1 %v3719_v40  ;;  %v131_v37 = vld [vmem:[#allocation2] sm:$0xff]  ;;  %v3804_v39 = vld [vmem:[#allocation10] ss:$16 sps:$4 sm:$0xff]   ;;  %v3806_v40 = vld [vmem:[#allocation10 + $0x4] ss:$16 sps:$4 sm:$0xff]   ;;  %s3190_s27 = sshll.u32 %s4418_s26, 4  ;;  %s3191_s27 = int_to_ptr.vmem [resolvable:$true] %s3190_s27 }
  0x9e   :  { %808 = vmatprep.mubr.bf16.mxu0 %v134_v10  ;;  %849 = vmatprep.mubr.bf16.mxu1 %v134_v10  ;;  %v133_v38 = vpack.c.bf16 %v131_v37, %v131_v37  ;;  %v3855_v10 = vld [vmem:[#allocation10 + $0x108] ss:$16 sps:$4 sm:$0xff]   ;;  %v3894_v37 = vld [vmem:[#allocation10 + $0x1e0] ss:$16 sps:$4 sm:$0xff]   ;;  %s4374_s7 = scalar_lea.vmem %s3191_s27, 128  ;;  %p4379_p1 = scmp.lt.s32.totalorder %s3191_s27, %s3191_s27 }
  0x9f   :  { %p4375_p0 = scmp.ne.s32.totalorder %s3191_s27, %s4374_s7  ;;  %p4380_p2 = scmp.lt.s32.totalorder %s4374_s7, %s4374_s7 }
  0xa0   :  { %779 = vmatpush1.bf16.msra.mxu0 %v3714_v41  ;;  %820 = vmatpush1.bf16.msra.mxu1 %v3717_v42  ;;  %v3807_v41 = vld [vmem:[#allocation10 + $0x8] ss:$16 sps:$4 sm:$0xff]   ;;  %v3809_v42 = vld [vmem:[#allocation10 + $0xc] ss:$16 sps:$4 sm:$0xff]  }
  0xa1   :  { %780 = vmatprep.subr.bf16.mxu0 %v3722_v43  ;;  %821 = vmatprep.subr.bf16.mxu1 %v3725_v44  ;;  %v3812_v43 = vld [vmem:[#allocation10 + $0x24] ss:$16 sps:$4 sm:$0xff]   ;;  %v3815_v44 = vld [vmem:[#allocation10 + $0x2c] ss:$16 sps:$4 sm:$0xff]   ;;  %p4381_p3 = por %p4380_p2, %p4379_p1 }
  0xa3   :  { %p4382_p4 = pnand %p4381_p3, %p4375_p0 }
  0xa4   :  { %781 = vmatpush1.bf16.msra.mxu0 %v3720_v45  ;;  %822 = vmatpush1.bf16.msra.mxu1 %v3723_v46  ;;  %v3810_v45 = vld [vmem:[#allocation10 + $0x20] ss:$16 sps:$4 sm:$0xff]   ;;  %v3813_v46 = vld [vmem:[#allocation10 + $0x28] ss:$16 sps:$4 sm:$0xff]  }
  0xa5   :  { %782 = vmatprep.subr.bf16.mxu0 %v3728_v47  ;;  %823 = vmatprep.subr.bf16.mxu1 %v3731_v48  ;;  %v3818_v47 = vld [vmem:[#allocation10 + $0x44] ss:$16 sps:$4 sm:$0xff]   ;;  %v3821_v48 = vld [vmem:[#allocation10 + $0x4c] ss:$16 sps:$4 sm:$0xff]  }
  0xa8   :  { %783 = vmatpush1.bf16.msra.mxu0 %v3726_v49  ;;  %824 = vmatpush1.bf16.msra.mxu1 %v3729_v50  ;;  %v3816_v49 = vld [vmem:[#allocation10 + $0x40] ss:$16 sps:$4 sm:$0xff]   ;;  %v3819_v50 = vld [vmem:[#allocation10 + $0x48] ss:$16 sps:$4 sm:$0xff]  }
  0xa9   :  { %784 = vmatprep.subr.bf16.mxu0 %v3734_v51  ;;  %825 = vmatprep.subr.bf16.mxu1 %v3737_v52  ;;  %v3824_v51 = vld [vmem:[#allocation10 + $0x64] ss:$16 sps:$4 sm:$0xff]   ;;  %v3827_v52 = vld [vmem:[#allocation10 + $0x6c] ss:$16 sps:$4 sm:$0xff]  }
  0xac   :  { %785 = vmatpush1.bf16.msra.mxu0 %v3732_v53  ;;  %826 = vmatpush1.bf16.msra.mxu1 %v3735_v54  ;;  %v3822_v53 = vld [vmem:[#allocation10 + $0x60] ss:$16 sps:$4 sm:$0xff]   ;;  %v3825_v54 = vld [vmem:[#allocation10 + $0x68] ss:$16 sps:$4 sm:$0xff]  }
  0xad   :  { %786 = vmatprep.subr.bf16.mxu0 %v3740_v55  ;;  %827 = vmatprep.subr.bf16.mxu1 %v3743_v56  ;;  %v3830_v55 = vld [vmem:[#allocation10 + $0x84] ss:$16 sps:$4 sm:$0xff]   ;;  %v3833_v56 = vld [vmem:[#allocation10 + $0x8c] ss:$16 sps:$4 sm:$0xff]  }
  0xb0   :  { %787 = vmatpush1.bf16.msra.mxu0 %v3738_v57  ;;  %828 = vmatpush1.bf16.msra.mxu1 %v3741_v58  ;;  %v3828_v57 = vld [vmem:[#allocation10 + $0x80] ss:$16 sps:$4 sm:$0xff]   ;;  %v3831_v58 = vld [vmem:[#allocation10 + $0x88] ss:$16 sps:$4 sm:$0xff]  }
  0xb1   :  { %788 = vmatprep.subr.bf16.mxu0 %v3746_v59  ;;  %829 = vmatprep.subr.bf16.mxu1 %v3749_v60  ;;  %v3836_v59 = vld [vmem:[#allocation10 + $0xa4] ss:$16 sps:$4 sm:$0xff]   ;;  %v3834_v60 = vld [vmem:[#allocation10 + $0xa0] ss:$16 sps:$4 sm:$0xff]  }
  0xb4   :  { %789 = vmatpush1.bf16.msra.mxu0 %v3744_v61  ;;  %830 = vmatpush1.bf16.msra.mxu1 %v3747_v62  ;;  %v3839_v61 = vld [vmem:[#allocation10 + $0xac] ss:$16 sps:$4 sm:$0xff]   ;;  %v3837_v62 = vld [vmem:[#allocation10 + $0xa8] ss:$16 sps:$4 sm:$0xff]  }
  0xb5   :  { %790 = vmatprep.subr.bf16.mxu0 %v3752_v63  ;;  %831 = vmatprep.subr.bf16.mxu1 %v3755_v0  ;;  %v3842_v63 = vld [vmem:[#allocation10 + $0xc4] ss:$16 sps:$4 sm:$0xff]   ;;  %v3845_v0 = vld [vmem:[#allocation10 + $0xcc] ss:$16 sps:$4 sm:$0xff]  }
  0xb8   :  { %791 = vmatpush1.bf16.msra.mxu0 %v3750_v1  ;;  %832 = vmatpush1.bf16.msra.mxu1 %v3753_v2  ;;  %v3840_v1 = vld [vmem:[#allocation10 + $0xc0] ss:$16 sps:$4 sm:$0xff]   ;;  %v3843_v2 = vld [vmem:[#allocation10 + $0xc8] ss:$16 sps:$4 sm:$0xff]  }
  0xb9   :  { %792 = vmatprep.subr.bf16.mxu0 %v3758_v3  ;;  %833 = vmatprep.subr.bf16.mxu1 %v3761_v4  ;;  %v3848_v3 = vld [vmem:[#allocation10 + $0xe4] ss:$16 sps:$4 sm:$0xff]   ;;  %v3851_v4 = vld [vmem:[#allocation10 + $0xec] ss:$16 sps:$4 sm:$0xff]  }
  0xbc   :  { %793 = vmatpush1.bf16.msra.mxu0 %v3756_v5  ;;  %834 = vmatpush1.bf16.msra.mxu1 %v3759_v6  ;;  %v3846_v5 = vld [vmem:[#allocation10 + $0xe0] ss:$16 sps:$4 sm:$0xff]   ;;  %v3849_v6 = vld [vmem:[#allocation10 + $0xe8] ss:$16 sps:$4 sm:$0xff]  }
  0xbd   :  { %794 = vmatprep.subr.bf16.mxu0 %v3764_v7  ;;  %835 = vmatprep.subr.bf16.mxu1 %v3767_v9  ;;  %v3854_v7 = vld [vmem:[#allocation10 + $0x104] ss:$16 sps:$4 sm:$0xff]   ;;  %v3852_v9 = vld [vmem:[#allocation10 + $0x100] ss:$16 sps:$4 sm:$0xff]  }
  0xc0   :  { %795 = vmatpush1.bf16.msra.mxu0 %v3762_v11  ;;  %836 = vmatpush1.bf16.msra.mxu1 %v3765_v12  ;;  %v3860_v11 = vld [vmem:[#allocation10 + $0x124] ss:$16 sps:$4 sm:$0xff]   ;;  %v3863_v12 = vld [vmem:[#allocation10 + $0x12c] ss:$16 sps:$4 sm:$0xff]  }
  0xc1   :  { %796 = vmatprep.subr.bf16.mxu0 %v3770_v13  ;;  %837 = vmatprep.subr.bf16.mxu1 %v3773_v14  ;;  %v3858_v13 = vld [vmem:[#allocation10 + $0x120] ss:$16 sps:$4 sm:$0xff]   ;;  %v3861_v14 = vld [vmem:[#allocation10 + $0x128] ss:$16 sps:$4 sm:$0xff]  }
  0xc4   :  { %797 = vmatpush1.bf16.msra.mxu0 %v3768_v15  ;;  %838 = vmatpush1.bf16.msra.mxu1 %v3771_v16  ;;  %v3866_v15 = vld [vmem:[#allocation10 + $0x144] ss:$16 sps:$4 sm:$0xff]   ;;  %v3869_v16 = vld [vmem:[#allocation10 + $0x14c] ss:$16 sps:$4 sm:$0xff]  }
  0xc5   :  { %798 = vmatprep.subr.bf16.mxu0 %v3776_v17  ;;  %839 = vmatprep.subr.bf16.mxu1 %v3779_v18  ;;  %v3864_v17 = vld [vmem:[#allocation10 + $0x140] ss:$16 sps:$4 sm:$0xff]   ;;  %v3867_v18 = vld [vmem:[#allocation10 + $0x148] ss:$16 sps:$4 sm:$0xff]  }
  0xc8   :  { %799 = vmatpush1.bf16.msra.mxu0 %v3774_v19  ;;  %840 = vmatpush1.bf16.msra.mxu1 %v3777_v20  ;;  %v3872_v19 = vld [vmem:[#allocation10 + $0x164] ss:$16 sps:$4 sm:$0xff]   ;;  %v3875_v20 = vld [vmem:[#allocation10 + $0x16c] ss:$16 sps:$4 sm:$0xff]  }
  0xc9   :  { %800 = vmatprep.subr.bf16.mxu0 %v3782_v21  ;;  %841 = vmatprep.subr.bf16.mxu1 %v3785_v22  ;;  %v3870_v21 = vld [vmem:[#allocation10 + $0x160] ss:$16 sps:$4 sm:$0xff]   ;;  %v3873_v22 = vld [vmem:[#allocation10 + $0x168] ss:$16 sps:$4 sm:$0xff]  }
  0xcc   :  { %801 = vmatpush1.bf16.msra.mxu0 %v3780_v23  ;;  %842 = vmatpush1.bf16.msra.mxu1 %v3783_v24  ;;  %v3878_v23 = vld [vmem:[#allocation10 + $0x184] ss:$16 sps:$4 sm:$0xff]   ;;  %v3881_v24 = vld [vmem:[#allocation10 + $0x18c] ss:$16 sps:$4 sm:$0xff]  }
  0xcd   :  { %802 = vmatprep.subr.bf16.mxu0 %v3788_v25  ;;  %843 = vmatprep.subr.bf16.mxu1 %v3791_v26  ;;  %v3876_v25 = vld [vmem:[#allocation10 + $0x180] ss:$16 sps:$4 sm:$0xff]   ;;  %v3879_v26 = vld [vmem:[#allocation10 + $0x188] ss:$16 sps:$4 sm:$0xff]  }
  0xd0   :  { %803 = vmatpush1.bf16.msra.mxu0 %v3786_v27  ;;  %844 = vmatpush1.bf16.msra.mxu1 %v3789_v28  ;;  %v3884_v27 = vld [vmem:[#allocation10 + $0x1a4] ss:$16 sps:$4 sm:$0xff]   ;;  %v3887_v28 = vld [vmem:[#allocation10 + $0x1ac] ss:$16 sps:$4 sm:$0xff]  }
  0xd1   :  { %804 = vmatprep.subr.bf16.mxu0 %v3794_v29  ;;  %845 = vmatprep.subr.bf16.mxu1 %v3797_v30  ;;  %v3882_v29 = vld [vmem:[#allocation10 + $0x1a0] ss:$16 sps:$4 sm:$0xff]   ;;  %v3885_v30 = vld [vmem:[#allocation10 + $0x1a8] ss:$16 sps:$4 sm:$0xff]  }
  0xd4   :  { %805 = vmatpush1.bf16.msra.mxu0 %v3792_v31  ;;  %846 = vmatpush1.bf16.msra.mxu1 %v3795_v32  ;;  %v3890_v31 = vld [vmem:[#allocation10 + $0x1c4] ss:$16 sps:$4 sm:$0xff]   ;;  %v3893_v32 = vld [vmem:[#allocation10 + $0x1cc] ss:$16 sps:$4 sm:$0xff]  }
  0xd5   :  { %806 = vmatprep.subr.bf16.mxu0 %v3800_v33  ;;  %847 = vmatprep.subr.bf16.mxu1 %v3803_v34  ;;  %v3888_v33 = vld [vmem:[#allocation10 + $0x1c0] ss:$16 sps:$4 sm:$0xff]   ;;  %v3891_v34 = vld [vmem:[#allocation10 + $0x1c8] ss:$16 sps:$4 sm:$0xff]  }
  0xd8   :  { %807 = vmatpush1.bf16.msra.mxu0 %v3798_v35  ;;  %848 = vmatpush1.bf16.msra.mxu1 %v3801_v36  ;;  %v3896_v35 = vld [vmem:[#allocation10 + $0x1e4] ss:$16 sps:$4 sm:$0xff]   ;;  %v3899_v36 = vld [vmem:[#allocation10 + $0x1ec] ss:$16 sps:$4 sm:$0xff]  }
  0xd9   :  { %1690 = vmatprep.subr.bf16.mxu0 %v3806_v40  ;;  %1772 = vmatprep.subr.bf16.mxu1 %v3809_v42  ;;  %v3905_v40 = vld [vmem:[#allocation10 + $0x20c] ss:$16 sps:$4 sm:$0xff]  }
  0xdb   :  { %809 = vmatmul.mubr.bf16.vlgmr.msra.gmra.mrb[4].mxu0 %v133_v38  ;;  %850 = vmatmul.mubr.bf16.vlgmr.msra.gmra.mrb[4].mxu1 %v133_v38  ;;  %v3897_v38 = vld [vmem:[#allocation10 + $0x1e8] ss:$16 sps:$4 sm:$0xff]  }
  0xdc   :  { %1691 = vmatpush1.bf16.msra.mxu0 %v3804_v39  ;;  %1773 = vmatpush1.bf16.msra.mxu1 %v3807_v41  ;;  %v3902_v39 = vld [vmem:[#allocation10 + $0x204] ss:$16 sps:$4 sm:$0xff]  }
  0xdd   :  { %1692 = vmatprep.subr.bf16.mxu0 %v3812_v43  ;;  %1774 = vmatprep.subr.bf16.mxu1 %v3815_v44 }
  0xe0   :  { %1693 = vmatpush1.bf16.msra.mxu0 %v3810_v45  ;;  %1775 = vmatpush1.bf16.msra.mxu1 %v3813_v46 }
  0xe1   :  { %1694 = vmatprep.subr.bf16.mxu0 %v3818_v47  ;;  %1776 = vmatprep.subr.bf16.mxu1 %v3821_v48 }
  0xe4   :  { %1695 = vmatpush1.bf16.msra.mxu0 %v3816_v49  ;;  %1777 = vmatpush1.bf16.msra.mxu1 %v3819_v50  ;;  %v860_v49 = vlaneseq }
  0xe5   :  { %1696 = vmatprep.subr.bf16.mxu0 %v3824_v51  ;;  %1778 = vmatprep.subr.bf16.mxu1 %v3827_v52 }
  0xe6   :  { %v861_v50 = vshrl.u32 %v860_v49, 7  ;;  %v3942_v49 = vld [vmem:[#allocation10 + $0x2e0] ss:$16 sps:$4 sm:$0xff]  }
  0xe8   :  { %1697 = vmatpush1.bf16.msra.mxu0 %v3822_v53  ;;  %1779 = vmatpush1.bf16.msra.mxu1 %v3825_v54  ;;  %v4575_v51 = vsub.s32 0, %v861_v50  ;;  %v4577_v52 = vsub.s32 2, %v861_v50  ;;  %v858_v53 = vld [vmem:[%s4637_s4] sm:$0xf]  ;;  %v4582_v54 = vsub.s32 1, %v861_v50 }
  0xe9   :  { %1698 = vmatprep.subr.bf16.mxu0 %v3830_v55  ;;  %1780 = vmatprep.subr.bf16.mxu1 %v3833_v56  ;;  %v4584_v55 = vsub.s32 3, %v861_v50  ;;  %v3945_v50 = vld [vmem:[#allocation10 + $0x2e8] ss:$16 sps:$4 sm:$0xff]  }
  0xea   :  { %v863_v56 = vrot.slane %v858_v53, %v4575_v51 }
  0xec   :  { %1699 = vmatpush1.bf16.msra.mxu0 %v3828_v57  ;;  %1781 = vmatpush1.bf16.msra.mxu1 %v3831_v58  ;;  %v871_v57 = vrot.slane %v858_v53, %v4577_v52 }
  0xed   :  { %1700 = vmatprep.subr.bf16.mxu0 %v3836_v59  ;;  %1782 = vmatprep.subr.bf16.mxu1 %v3839_v61  ;;  %v875_v61 = vrot.slane %v858_v53, %v4584_v55 }
  0xf0   :  { %1701 = vmatpush1.bf16.msra.mxu0 %v3834_v60  ;;  %1783 = vmatpush1.bf16.msra.mxu1 %v3837_v62  ;;  %v867_v60 = vrot.slane %v858_v53, %v4582_v54  ;;  %v3950_v53 = vld [vmem:[#allocation10 + $0x304] ss:$16 sps:$4 sm:$0xff]  }
  0xf1   :  { %1702 = vmatprep.subr.bf16.mxu0 %v3842_v63  ;;  %1784 = vmatprep.subr.bf16.mxu1 %v3845_v0 }
  0xf4   :  { %1703 = vmatpush1.bf16.msra.mxu0 %v3840_v1  ;;  %1785 = vmatpush1.bf16.msra.mxu1 %v3843_v2 }
  0xf5   :  { %1704 = vmatprep.subr.bf16.mxu0 %v3848_v3  ;;  %1786 = vmatprep.subr.bf16.mxu1 %v3851_v4 }
  0xf8   :  { %1705 = vmatpush1.bf16.msra.mxu0 %v3846_v5  ;;  %1787 = vmatpush1.bf16.msra.mxu1 %v3849_v6 }
  0xf9   :  { %1706 = vmatprep.subr.bf16.mxu0 %v3854_v7  ;;  %1788 = vmatprep.subr.bf16.mxu1 %v3857_v8 }
  0xfc   :  { %1707 = vmatpush1.bf16.msra.mxu0 %v3852_v9  ;;  %1789 = vmatpush1.bf16.msra.mxu1 %v3855_v10 }
  0xfd   :  { %1708 = vmatprep.subr.bf16.mxu0 %v3860_v11  ;;  %1790 = vmatprep.subr.bf16.mxu1 %v3863_v12 }
 0x100   :  { %1709 = vmatpush1.bf16.msra.mxu0 %v3858_v13  ;;  %1791 = vmatpush1.bf16.msra.mxu1 %v3861_v14 }
 0x101   :  { %1710 = vmatprep.subr.bf16.mxu0 %v3866_v15  ;;  %1792 = vmatprep.subr.bf16.mxu1 %v3869_v16 }
 0x104   :  { %1711 = vmatpush1.bf16.msra.mxu0 %v3864_v17  ;;  %1793 = vmatpush1.bf16.msra.mxu1 %v3867_v18  ;;  %v3900_v18 = vld [vmem:[#allocation10 + $0x200] ss:$16 sps:$4 sm:$0xff]  }
 0x105   :  { %1712 = vmatprep.subr.bf16.mxu0 %v3872_v19  ;;  %1794 = vmatprep.subr.bf16.mxu1 %v3875_v20  ;;  %v3903_v19 = vld [vmem:[#allocation10 + $0x208] ss:$16 sps:$4 sm:$0xff]  }
 0x108   :  { %1713 = vmatpush1.bf16.msra.mxu0 %v3870_v21  ;;  %1795 = vmatpush1.bf16.msra.mxu1 %v3873_v22  ;;  %v3908_v22 = vld [vmem:[#allocation10 + $0x224] ss:$16 sps:$4 sm:$0xff]  }
 0x109   :  { %1714 = vmatprep.subr.bf16.mxu0 %v3878_v23  ;;  %1796 = vmatprep.subr.bf16.mxu1 %v3881_v24  ;;  %v3911_v23 = vld [vmem:[#allocation10 + $0x22c] ss:$16 sps:$4 sm:$0xff]  }
 0x10c   :  { %1715 = vmatpush1.bf16.msra.mxu0 %v3876_v25  ;;  %1797 = vmatpush1.bf16.msra.mxu1 %v3879_v26  ;;  %v3906_v25 = vld [vmem:[#allocation10 + $0x220] ss:$16 sps:$4 sm:$0xff]   ;;  %v3909_v26 = vld [vmem:[#allocation10 + $0x228] ss:$16 sps:$4 sm:$0xff]  }
 0x10d   :  { %1716 = vmatprep.subr.bf16.mxu0 %v3884_v27  ;;  %1798 = vmatprep.subr.bf16.mxu1 %v3887_v28  ;;  %v3914_v27 = vld [vmem:[#allocation10 + $0x244] ss:$16 sps:$4 sm:$0xff]   ;;  %v3917_v28 = vld [vmem:[#allocation10 + $0x24c] ss:$16 sps:$4 sm:$0xff]  }
 0x110   :  { %1717 = vmatpush1.bf16.msra.mxu0 %v3882_v29  ;;  %1799 = vmatpush1.bf16.msra.mxu1 %v3885_v30  ;;  %v3912_v29 = vld [vmem:[#allocation10 + $0x240] ss:$16 sps:$4 sm:$0xff]   ;;  %v3915_v30 = vld [vmem:[#allocation10 + $0x248] ss:$16 sps:$4 sm:$0xff]  }
 0x111   :  { %1718 = vmatprep.subr.bf16.mxu0 %v3890_v31  ;;  %1800 = vmatprep.subr.bf16.mxu1 %v3893_v32  ;;  %v3920_v31 = vld [vmem:[#allocation10 + $0x264] ss:$16 sps:$4 sm:$0xff]   ;;  %v3923_v32 = vld [vmem:[#allocation10 + $0x26c] ss:$16 sps:$4 sm:$0xff]  }
 0x114   :  { %1719 = vmatpush1.bf16.msra.mxu0 %v3888_v33  ;;  %1801 = vmatpush1.bf16.msra.mxu1 %v3891_v34  ;;  %v3918_v33 = vld [vmem:[#allocation10 + $0x260] ss:$16 sps:$4 sm:$0xff]   ;;  %v3921_v34 = vld [vmem:[#allocation10 + $0x268] ss:$16 sps:$4 sm:$0xff]  }
 0x115   :  { %1720 = vmatprep.subr.bf16.mxu0 %v3896_v35  ;;  %1802 = vmatprep.subr.bf16.mxu1 %v3899_v36  ;;  %v3926_v35 = vld [vmem:[#allocation10 + $0x284] ss:$16 sps:$4 sm:$0xff]   ;;  %v3929_v36 = vld [vmem:[#allocation10 + $0x28c] ss:$16 sps:$4 sm:$0xff]  }
 0x118   :  { %1721 = vmatpush1.bf16.msra.mxu0 %v3894_v37  ;;  %1803 = vmatpush1.bf16.msra.mxu1 %v3897_v38  ;;  %v3924_v37 = vld [vmem:[#allocation10 + $0x280] ss:$16 sps:$4 sm:$0xff]   ;;  %v3927_v38 = vld [vmem:[#allocation10 + $0x288] ss:$16 sps:$4 sm:$0xff]  }
 0x119   :  { %1731 = vmatprep.subr.bf16.mxu0 %v3902_v39  ;;  %1813 = vmatprep.subr.bf16.mxu1 %v3905_v40  ;;  %v3932_v39 = vld [vmem:[#allocation10 + $0x2a4] ss:$16 sps:$4 sm:$0xff]   ;;  %v3935_v40 = vld [vmem:[#allocation10 + $0x2ac] ss:$16 sps:$4 sm:$0xff]  }
 0x16e   :  { %v408_v41 = vpop.f32.mrb[0].mxu0  ;;  %v449_v42 = vpop.f32.mrb[0].mxu1 }
 0x16f   :  { %v410_v43 = vpop.f32.mrb[1].mxu0  ;;  %v451_v44 = vpop.f32.mrb[1].mxu1 }
 0x170   :  { %v412_v45 = vpop.f32.mrb[2].mxu0  ;;  %v453_v46 = vpop.f32.mrb[2].mxu1 }
 0x171   :  { %v413_v47 = vpop.f32.mrb[3].mxu0  ;;  %v454_v48 = vpop.f32.mrb[3].mxu1  ;;  %v3936_v45 = vld [vmem:[#allocation10 + $0x2c0] ss:$16 sps:$4 sm:$0xff]   ;;  %v3939_v46 = vld [vmem:[#allocation10 + $0x2c8] ss:$16 sps:$4 sm:$0xff]  }
 0x172   :  { %v3944_v47 = vld [vmem:[#allocation10 + $0x2e4] ss:$16 sps:$4 sm:$0xff]   ;;  %v3947_v48 = vld [vmem:[#allocation10 + $0x2ec] ss:$16 sps:$4 sm:$0xff]  }
 0x1ae   :  { %v810_v58 = vpop.f32.mrb[4].mxu0  ;;  %v851_v59 = vpop.f32.mrb[4].mxu1 }
 0x1af   :  { %v811_v62 = vadd.f32 %v810_v58, %v408_v41  ;;  %v852_v63 = vadd.f32 %v851_v59, %v449_v42  ;;  %v812_v0 = vpop.f32.mrb[5].mxu0  ;;  %v853_v1 = vpop.f32.mrb[5].mxu1  ;;  %v3930_v41 = vld [vmem:[#allocation10 + $0x2a0] ss:$16 sps:$4 sm:$0xff]   ;;  %v3933_v42 = vld [vmem:[#allocation10 + $0x2a8] ss:$16 sps:$4 sm:$0xff]  }
 0x1b0   :  { %v813_v2 = vadd.f32 %v812_v0, %v410_v43  ;;  %v854_v3 = vadd.f32 %v853_v1, %v451_v44  ;;  %v814_v4 = vpop.f32.mrb[6].mxu0  ;;  %v855_v5 = vpop.f32.mrb[6].mxu1  ;;  %v3938_v43 = vld [vmem:[#allocation10 + $0x2c4] ss:$16 sps:$4 sm:$0xff]   ;;  %v3941_v44 = vld [vmem:[#allocation10 + $0x2cc] ss:$16 sps:$4 sm:$0xff]  }
 0x1b1   :  { %v880_v6 = vadd.f32 %v863_v56, %v811_v62  ;;  %v4590_v7 = vadd.f32 %v871_v57, %v852_v63  ;;  %v815_v8 = vpop.f32.mrb[7].mxu0  ;;  %v856_v9 = vpop.f32.mrb[7].mxu1  ;;  %v3953_v56 = vld [vmem:[#allocation10 + $0x30c] ss:$16 sps:$4 sm:$0xff]   ;;  %v3948_v57 = vld [vmem:[#allocation10 + $0x300] ss:$16 sps:$4 sm:$0xff]  }
 0x1b2   :  { %v881_v10 = vadd.f32 %v867_v60, %v813_v2  ;;  %v883_v11 = vadd.f32 %v875_v61, %v854_v3  ;;  %v3951_v58 = vld [vmem:[#allocation10 + $0x308] ss:$16 sps:$4 sm:$0xff]   ;;  %v3956_v59 = vld [vmem:[#allocation10 + $0x324] ss:$16 sps:$4 sm:$0xff]   ;;  %v3959_v60 = vld [vmem:[#allocation10 + $0x32c] ss:$16 sps:$4 sm:$0xff]  }
 0x1b3   :  { %vm884_vm2 = vcmp.gt.f32.partialorder %v880_v6, 0.0  ;;  %v888_v12 = vmul.f32 0.2, %v880_v6  ;;  %v3954_v61 = vld [vmem:[#allocation10 + $0x320] ss:$16 sps:$4 sm:$0xff]   ;;  %vm886_vm5 = vcmp.gt.f32.partialorder %v4590_v7, 0.0 }
 0x1b4   :  { %v889_v13 = vmul.f32 0.2, %v881_v10  ;;  %v891_v14 = vmul.f32 0.2, %v883_v11  ;;  %vm885_vm3 = vcmp.gt.f32.partialorder %v881_v10, 0.0  ;;  %vm887_vm4 = vcmp.gt.f32.partialorder %v883_v11, 0.0 }
 0x1b5   :  { %v892_v15 = vsel %vm884_vm2, %v880_v6, %v888_v12  ;;  %v3957_v62 = vld [vmem:[#allocation10 + $0x328] ss:$16 sps:$4 sm:$0xff]   ;;  %v3962_v63 = vld [vmem:[#allocation10 + $0x344] ss:$16 sps:$4 sm:$0xff]   ;;  %v3965_v0 = vld [vmem:[#allocation10 + $0x34c] ss:$16 sps:$4 sm:$0xff]  }
 0x1b6   :  { %v893_v16 = vsel %vm885_vm3, %v881_v10, %v889_v13  ;;  %v895_v20 = vsel %vm887_vm4, %v883_v11, %v891_v14  ;;  %v896_v21 = vpack.c.bf16 %v892_v15, %v892_v15  ;;  %v3960_v1 = vld [vmem:[#allocation10 + $0x340] ss:$16 sps:$4 sm:$0xff]   ;;  %v3963_v2 = vld [vmem:[#allocation10 + $0x348] ss:$16 sps:$4 sm:$0xff]   ;;  %v3968_v3 = vld [vmem:[#allocation10 + $0x364] ss:$16 sps:$4 sm:$0xff]  }
 0x1b7   :  { %v897_v17 = vpack.c.bf16 %v893_v16, %v893_v16  ;;  %v899_v24 = vpack.c.bf16 %v895_v20, %v895_v20  ;;  %v3971_v4 = vld [vmem:[#allocation10 + $0x36c] ss:$16 sps:$4 sm:$0xff]   ;;  %v3966_v5 = vld [vmem:[#allocation10 + $0x360] ss:$16 sps:$4 sm:$0xff]   ;;  %v3969_v6 = vld [vmem:[#allocation10 + $0x368] ss:$16 sps:$4 sm:$0xff]  }
 0x1b8   :  { %v3974_v8 = vld [vmem:[#allocation10 + $0x384] ss:$16 sps:$4 sm:$0xff]   ;;  %v3977_v9 = vld [vmem:[#allocation10 + $0x38c] ss:$16 sps:$4 sm:$0xff]   ;;  %v3972_v10 = vld [vmem:[#allocation10 + $0x380] ss:$16 sps:$4 sm:$0xff]  }
 0x1b9   :  { %1722 = vmatprep.mubr.bf16.mxu0 %v897_v17  ;;  %1804 = vmatprep.mubr.bf16.mxu1 %v897_v17  ;;  %v3975_v11 = vld [vmem:[#allocation10 + $0x388] ss:$16 sps:$4 sm:$0xff]   ;;  %v3980_v12 = vld [vmem:[#allocation10 + $0x3a4] ss:$16 sps:$4 sm:$0xff]   ;;  %v3983_v13 = vld [vmem:[#allocation10 + $0x3ac] ss:$16 sps:$4 sm:$0xff]  }
 0x1ba   :  { %1723 = vmatmul.mubr.bf16.vlgmr.msra.gmra.mrb[8].mxu0 %v896_v21  ;;  %1805 = vmatmul.mubr.bf16.vlgmr.msra.gmra.mrb[8].mxu1 %v896_v21  ;;  %v3978_v14 = vld [vmem:[#allocation10 + $0x3a0] ss:$16 sps:$4 sm:$0xff]   ;;  %v3981_v15 = vld [vmem:[#allocation10 + $0x3a8] ss:$16 sps:$4 sm:$0xff]   ;;  %v3986_v16 = vld [vmem:[#allocation10 + $0x3c4] ss:$16 sps:$4 sm:$0xff]  }
 0x1bb   :  { %1732 = vmatpush1.bf16.msra.mxu0 %v3900_v18  ;;  %1814 = vmatpush1.bf16.msra.mxu1 %v3903_v19  ;;  %v3989_v17 = vld [vmem:[#allocation10 + $0x3cc] ss:$16 sps:$4 sm:$0xff]   ;;  %v3984_v18 = vld [vmem:[#allocation10 + $0x3c0] ss:$16 sps:$4 sm:$0xff]   ;;  %v3987_v19 = vld [vmem:[#allocation10 + $0x3c8] ss:$16 sps:$4 sm:$0xff]  }
 0x1bc   :  { %1763 = vmatprep.mubr.bf16.mxu0 %v899_v24  ;;  %1845 = vmatprep.mubr.bf16.mxu1 %v899_v24  ;;  %v3992_v20 = vld [vmem:[#allocation10 + $0x3e4] ss:$16 sps:$4 sm:$0xff]   ;;  %v3995_v21 = vld [vmem:[#allocation10 + $0x3ec] ss:$16 sps:$4 sm:$0xff]   ;;  %v3993_v24 = vld [vmem:[#allocation10 + $0x3e8] ss:$16 sps:$4 sm:$0xff]  }
 0x1bd   :  { %1733 = vmatprep.subr.bf16.mxu0 %v3908_v22  ;;  %1815 = vmatprep.subr.bf16.mxu1 %v3911_v23  ;;  %v890_v22 = vmul.f32 0.2, %v4590_v7  ;;  %v3990_v23 = vld [vmem:[#allocation10 + $0x3e0] ss:$16 sps:$4 sm:$0xff]  }
 0x1bf   :  { %1734 = vmatpush1.bf16.msra.mxu0 %v3906_v25  ;;  %1816 = vmatpush1.bf16.msra.mxu1 %v3909_v26  ;;  %v3998_v25 = vld [vmem:[#allocation11 + $0x4] ss:$16 sps:$4 sm:$0xff]   ;;  %v4001_v26 = vld [vmem:[#allocation11 + $0xc] ss:$16 sps:$4 sm:$0xff]  }
 0x1c0   :  { %1735 = vmatprep.subr.bf16.mxu0 %v3914_v27  ;;  %1817 = vmatprep.subr.bf16.mxu1 %v3917_v28  ;;  %v894_v27 = vsel %vm886_vm5, %v4590_v7, %v890_v22  ;;  %v3996_v28 = vld [vmem:[#allocation11] ss:$16 sps:$4 sm:$0xff]   ;;  %v4077_v22 = vld [vmem:[#allocation11 + $0x1a8] ss:$16 sps:$4 sm:$0xff]  }
 0x1c1   :  { %v4008_v7 = vld [vmem:[#allocation11 + $0x40] ss:$16 sps:$4 sm:$0xff]  }
 0x1c3   :  { %1736 = vmatpush1.bf16.msra.mxu0 %v3912_v29  ;;  %1818 = vmatpush1.bf16.msra.mxu1 %v3915_v30  ;;  %v3999_v29 = vld [vmem:[#allocation11 + $0x8] ss:$16 sps:$4 sm:$0xff]   ;;  %v898_v30 = vpack.c.bf16 %v894_v27, %v894_v27  ;;  %v4088_v27 = vld [vmem:[#allocation11 + $0x1e4] ss:$16 sps:$4 sm:$0xff]  }
 0x1c4   :  { %1737 = vmatprep.subr.bf16.mxu0 %v3920_v31  ;;  %1819 = vmatprep.subr.bf16.mxu1 %v3923_v32  ;;  %v4004_v31 = vld [vmem:[#allocation11 + $0x24] ss:$16 sps:$4 sm:$0xff]   ;;  %v4007_v32 = vld [vmem:[#allocation11 + $0x2c] ss:$16 sps:$4 sm:$0xff]  }
 0x1c7   :  { %1738 = vmatpush1.bf16.msra.mxu0 %v3918_v33  ;;  %1820 = vmatpush1.bf16.msra.mxu1 %v3921_v34  ;;  %v4002_v33 = vld [vmem:[#allocation11 + $0x20] ss:$16 sps:$4 sm:$0xff]   ;;  %v4005_v34 = vld [vmem:[#allocation11 + $0x28] ss:$16 sps:$4 sm:$0xff]  }
 0x1c8   :  { %1739 = vmatprep.subr.bf16.mxu0 %v3926_v35  ;;  %1821 = vmatprep.subr.bf16.mxu1 %v3929_v36  ;;  %v4010_v35 = vld [vmem:[#allocation11 + $0x44] ss:$16 sps:$4 sm:$0xff]   ;;  %v4013_v36 = vld [vmem:[#allocation11 + $0x4c] ss:$16 sps:$4 sm:$0xff]  }
 0x1cb   :  { %1740 = vmatpush1.bf16.msra.mxu0 %v3924_v37  ;;  %1822 = vmatpush1.bf16.msra.mxu1 %v3927_v38  ;;  %v4011_v37 = vld [vmem:[#allocation11 + $0x48] ss:$16 sps:$4 sm:$0xff]   ;;  %v4016_v38 = vld [vmem:[#allocation11 + $0x64] ss:$16 sps:$4 sm:$0xff]  }
 0x1cc   :  { %1741 = vmatprep.subr.bf16.mxu0 %v3932_v39  ;;  %1823 = vmatprep.subr.bf16.mxu1 %v3935_v40  ;;  %v4019_v39 = vld [vmem:[#allocation11 + $0x6c] ss:$16 sps:$4 sm:$0xff]   ;;  %v4014_v40 = vld [vmem:[#allocation11 + $0x60] ss:$16 sps:$4 sm:$0xff]  }
 0x1cf   :  { %1742 = vmatpush1.bf16.msra.mxu0 %v3930_v41  ;;  %1824 = vmatpush1.bf16.msra.mxu1 %v3933_v42  ;;  %v4017_v41 = vld [vmem:[#allocation11 + $0x68] ss:$16 sps:$4 sm:$0xff]   ;;  %v4022_v42 = vld [vmem:[#allocation11 + $0x84] ss:$16 sps:$4 sm:$0xff]  }
 0x1d0   :  { %1743 = vmatprep.subr.bf16.mxu0 %v3938_v43  ;;  %1825 = vmatprep.subr.bf16.mxu1 %v3941_v44  ;;  %v4025_v43 = vld [vmem:[#allocation11 + $0x8c] ss:$16 sps:$4 sm:$0xff]   ;;  %v4020_v44 = vld [vmem:[#allocation11 + $0x80] ss:$16 sps:$4 sm:$0xff]  }
 0x1d3   :  { %1744 = vmatpush1.bf16.msra.mxu0 %v3936_v45  ;;  %1826 = vmatpush1.bf16.msra.mxu1 %v3939_v46  ;;  %v4023_v45 = vld [vmem:[#allocation11 + $0x88] ss:$16 sps:$4 sm:$0xff]   ;;  %v4028_v46 = vld [vmem:[#allocation11 + $0xa4] ss:$16 sps:$4 sm:$0xff]  }
 0x1d4   :  { %1745 = vmatprep.subr.bf16.mxu0 %v3944_v47  ;;  %1827 = vmatprep.subr.bf16.mxu1 %v3947_v48  ;;  %v4031_v47 = vld [vmem:[#allocation11 + $0xac] ss:$16 sps:$4 sm:$0xff]   ;;  %v4026_v48 = vld [vmem:[#allocation11 + $0xa0] ss:$16 sps:$4 sm:$0xff]  }
 0x1d7   :  { %1746 = vmatpush1.bf16.msra.mxu0 %v3942_v49  ;;  %1828 = vmatpush1.bf16.msra.mxu1 %v3945_v50  ;;  %v4029_v49 = vld [vmem:[#allocation11 + $0xa8] ss:$16 sps:$4 sm:$0xff]   ;;  %v4034_v50 = vld [vmem:[#allocation11 + $0xc4] ss:$16 sps:$4 sm:$0xff]  }
 0x1d8   :  { %1747 = vmatprep.subr.bf16.mxu0 %v3950_v53  ;;  %1829 = vmatprep.subr.bf16.mxu1 %v3953_v56  ;;  %v4037_v53 = vld [vmem:[#allocation11 + $0xcc] ss:$16 sps:$4 sm:$0xff]   ;;  %v4032_v56 = vld [vmem:[#allocation11 + $0xc0] ss:$16 sps:$4 sm:$0xff]  }
 0x1db   :  { %1748 = vmatpush1.bf16.msra.mxu0 %v3948_v57  ;;  %1830 = vmatpush1.bf16.msra.mxu1 %v3951_v58  ;;  %v4035_v57 = vld [vmem:[#allocation11 + $0xc8] ss:$16 sps:$4 sm:$0xff]   ;;  %v4040_v58 = vld [vmem:[#allocation11 + $0xe4] ss:$16 sps:$4 sm:$0xff]  }
 0x1dc   :  { %1749 = vmatprep.subr.bf16.mxu0 %v3956_v59  ;;  %1831 = vmatprep.subr.bf16.mxu1 %v3959_v60  ;;  %v4043_v59 = vld [vmem:[#allocation11 + $0xec] ss:$16 sps:$4 sm:$0xff]   ;;  %v4038_v60 = vld [vmem:[#allocation11 + $0xe0] ss:$16 sps:$4 sm:$0xff]  }
 0x1df   :  { %1750 = vmatpush1.bf16.msra.mxu0 %v3954_v61  ;;  %1832 = vmatpush1.bf16.msra.mxu1 %v3957_v62  ;;  %v4041_v61 = vld [vmem:[#allocation11 + $0xe8] ss:$16 sps:$4 sm:$0xff]   ;;  %v4046_v62 = vld [vmem:[#allocation11 + $0x104] ss:$16 sps:$4 sm:$0xff]  }
 0x1e0   :  { %1751 = vmatprep.subr.bf16.mxu0 %v3962_v63  ;;  %1833 = vmatprep.subr.bf16.mxu1 %v3965_v0  ;;  %v4049_v63 = vld [vmem:[#allocation11 + $0x10c] ss:$16 sps:$4 sm:$0xff]   ;;  %v4044_v0 = vld [vmem:[#allocation11 + $0x100] ss:$16 sps:$4 sm:$0xff]  }
 0x1e3   :  { %1752 = vmatpush1.bf16.msra.mxu0 %v3960_v1  ;;  %1834 = vmatpush1.bf16.msra.mxu1 %v3963_v2  ;;  %v4047_v1 = vld [vmem:[#allocation11 + $0x108] ss:$16 sps:$4 sm:$0xff]   ;;  %v4052_v2 = vld [vmem:[#allocation11 + $0x124] ss:$16 sps:$4 sm:$0xff]  }
 0x1e4   :  { %1753 = vmatprep.subr.bf16.mxu0 %v3968_v3  ;;  %1835 = vmatprep.subr.bf16.mxu1 %v3971_v4  ;;  %v4055_v3 = vld [vmem:[#allocation11 + $0x12c] ss:$16 sps:$4 sm:$0xff]   ;;  %v4050_v4 = vld [vmem:[#allocation11 + $0x120] ss:$16 sps:$4 sm:$0xff]  }
 0x1e7   :  { %1754 = vmatpush1.bf16.msra.mxu0 %v3966_v5  ;;  %1836 = vmatpush1.bf16.msra.mxu1 %v3969_v6  ;;  %v4053_v5 = vld [vmem:[#allocation11 + $0x128] ss:$16 sps:$4 sm:$0xff]   ;;  %v4058_v6 = vld [vmem:[#allocation11 + $0x144] ss:$16 sps:$4 sm:$0xff]  }
 0x1e8   :  { %1755 = vmatprep.subr.bf16.mxu0 %v3974_v8  ;;  %1837 = vmatprep.subr.bf16.mxu1 %v3977_v9  ;;  %v4061_v8 = vld [vmem:[#allocation11 + $0x14c] ss:$16 sps:$4 sm:$0xff]   ;;  %v4056_v9 = vld [vmem:[#allocation11 + $0x140] ss:$16 sps:$4 sm:$0xff]  }
 0x1eb   :  { %1756 = vmatpush1.bf16.msra.mxu0 %v3972_v10  ;;  %1838 = vmatpush1.bf16.msra.mxu1 %v3975_v11  ;;  %v4059_v10 = vld [vmem:[#allocation11 + $0x148] ss:$16 sps:$4 sm:$0xff]   ;;  %v4064_v11 = vld [vmem:[#allocation11 + $0x164] ss:$16 sps:$4 sm:$0xff]  }
 0x1ec   :  { %1757 = vmatprep.subr.bf16.mxu0 %v3980_v12  ;;  %1839 = vmatprep.subr.bf16.mxu1 %v3983_v13  ;;  %v4067_v12 = vld [vmem:[#allocation11 + $0x16c] ss:$16 sps:$4 sm:$0xff]   ;;  %v4062_v13 = vld [vmem:[#allocation11 + $0x160] ss:$16 sps:$4 sm:$0xff]  }
 0x1ef   :  { %1758 = vmatpush1.bf16.msra.mxu0 %v3978_v14  ;;  %1840 = vmatpush1.bf16.msra.mxu1 %v3981_v15  ;;  %v4065_v14 = vld [vmem:[#allocation11 + $0x168] ss:$16 sps:$4 sm:$0xff]   ;;  %v4070_v15 = vld [vmem:[#allocation11 + $0x184] ss:$16 sps:$4 sm:$0xff]  }
 0x1f0   :  { %1759 = vmatprep.subr.bf16.mxu0 %v3986_v16  ;;  %1841 = vmatprep.subr.bf16.mxu1 %v3989_v17  ;;  %v4073_v16 = vld [vmem:[#allocation11 + $0x18c] ss:$16 sps:$4 sm:$0xff]   ;;  %v4068_v17 = vld [vmem:[#allocation11 + $0x180] ss:$16 sps:$4 sm:$0xff]  }
 0x1f3   :  { %1760 = vmatpush1.bf16.msra.mxu0 %v3984_v18  ;;  %1842 = vmatpush1.bf16.msra.mxu1 %v3987_v19  ;;  %v4071_v18 = vld [vmem:[#allocation11 + $0x188] ss:$16 sps:$4 sm:$0xff]   ;;  %v4076_v19 = vld [vmem:[#allocation11 + $0x1a4] ss:$16 sps:$4 sm:$0xff]  }
 0x1f4   :  { %1761 = vmatprep.subr.bf16.mxu0 %v3992_v20  ;;  %1843 = vmatprep.subr.bf16.mxu1 %v3995_v21  ;;  %v4079_v20 = vld [vmem:[#allocation11 + $0x1ac] ss:$16 sps:$4 sm:$0xff]   ;;  %v4074_v21 = vld [vmem:[#allocation11 + $0x1a0] ss:$16 sps:$4 sm:$0xff]  }
 0x1f7   :  { %1762 = vmatpush1.bf16.msra.mxu0 %v3990_v23  ;;  %1844 = vmatpush1.bf16.msra.mxu1 %v3993_v24  ;;  %v4082_v23 = vld [vmem:[#allocation11 + $0x1c4] ss:$16 sps:$4 sm:$0xff]   ;;  %v4085_v24 = vld [vmem:[#allocation11 + $0x1cc] ss:$16 sps:$4 sm:$0xff]  }
 0x1f8   :  { %2660 = vmatprep.subr.bf16.mxu0 %v3998_v25  ;;  %2742 = vmatprep.subr.bf16.mxu1 %v4001_v26  ;;  %v4080_v25 = vld [vmem:[#allocation11 + $0x1c0] ss:$16 sps:$4 sm:$0xff]   ;;  %v4083_v26 = vld [vmem:[#allocation11 + $0x1c8] ss:$16 sps:$4 sm:$0xff]  }
 0x1fa   :  { %1764 = vmatmul.mubr.bf16.vlgmr.msra.gmra.mrb[8].mxu0 %v898_v30  ;;  %1846 = vmatmul.mubr.bf16.vlgmr.msra.gmra.mrb[8].mxu1 %v898_v30  ;;  %v4089_v30 = vld [vmem:[#allocation11 + $0x1e8] ss:$16 sps:$4 sm:$0xff]  }
 0x1fb   :  { %2661 = vmatpush1.bf16.msra.mxu0 %v3996_v28  ;;  %2743 = vmatpush1.bf16.msra.mxu1 %v3999_v29  ;;  %v4091_v28 = vld [vmem:[#allocation11 + $0x1ec] ss:$16 sps:$4 sm:$0xff]   ;;  %v4086_v29 = vld [vmem:[#allocation11 + $0x1e0] ss:$16 sps:$4 sm:$0xff]  }
 0x1fc   :  { %2662 = vmatprep.subr.bf16.mxu0 %v4004_v31  ;;  %2744 = vmatprep.subr.bf16.mxu1 %v4007_v32  ;;  %v4094_v31 = vld [vmem:[#allocation11 + $0x204] ss:$16 sps:$4 sm:$0xff]   ;;  %v4097_v32 = vld [vmem:[#allocation11 + $0x20c] ss:$16 sps:$4 sm:$0xff]  }
 0x1ff   :  { %2663 = vmatpush1.bf16.msra.mxu0 %v4002_v33  ;;  %2745 = vmatpush1.bf16.msra.mxu1 %v4005_v34  ;;  %v4598_v33 = vld [vmem:[%s4639_s6] sm:$0xf] }
 0x200   :  { %2664 = vmatprep.subr.bf16.mxu0 %v4010_v35  ;;  %2746 = vmatprep.subr.bf16.mxu1 %v4013_v36  ;;  %v1033_v34 = vrot.slane %v4598_v33, %v4575_v51  ;;  %v1037_v35 = vrot.slane %v4598_v33, %v4582_v54  ;;  %v1045_v36 = vrot.slane %v4598_v33, %v4584_v55 }
 0x203   :  { %2665 = vmatpush1.bf16.msra.mxu0 %v4008_v7  ;;  %2747 = vmatpush1.bf16.msra.mxu1 %v4011_v37 }
 0x204   :  { %2666 = vmatprep.subr.bf16.mxu0 %v4016_v38  ;;  %2748 = vmatprep.subr.bf16.mxu1 %v4019_v39 }
 0x207   :  { %2667 = vmatpush1.bf16.msra.mxu0 %v4014_v40  ;;  %2749 = vmatpush1.bf16.msra.mxu1 %v4017_v41 }
 0x208   :  { %2668 = vmatprep.subr.bf16.mxu0 %v4022_v42  ;;  %2750 = vmatprep.subr.bf16.mxu1 %v4025_v43 }
 0x20b   :  { %2669 = vmatpush1.bf16.msra.mxu0 %v4020_v44  ;;  %2751 = vmatpush1.bf16.msra.mxu1 %v4023_v45 }
 0x20c   :  { %2670 = vmatprep.subr.bf16.mxu0 %v4028_v46  ;;  %2752 = vmatprep.subr.bf16.mxu1 %v4031_v47 }
 0x20f   :  { %2671 = vmatpush1.bf16.msra.mxu0 %v4026_v48  ;;  %2753 = vmatpush1.bf16.msra.mxu1 %v4029_v49 }
 0x210   :  { %2672 = vmatprep.subr.bf16.mxu0 %v4034_v50  ;;  %2754 = vmatprep.subr.bf16.mxu1 %v4037_v53 }
 0x213   :  { %2673 = vmatpush1.bf16.msra.mxu0 %v4032_v56  ;;  %2755 = vmatpush1.bf16.msra.mxu1 %v4035_v57  ;;  %v4092_v57 = vld [vmem:[#allocation11 + $0x200] ss:$16 sps:$4 sm:$0xff]  }
 0x214   :  { %2674 = vmatprep.subr.bf16.mxu0 %v4040_v58  ;;  %2756 = vmatprep.subr.bf16.mxu1 %v4043_v59  ;;  %v4095_v58 = vld [vmem:[#allocation11 + $0x208] ss:$16 sps:$4 sm:$0xff]  }
 0x217   :  { %2675 = vmatpush1.bf16.msra.mxu0 %v4038_v60  ;;  %2757 = vmatpush1.bf16.msra.mxu1 %v4041_v61  ;;  %v4100_v61 = vld [vmem:[#allocation11 + $0x224] ss:$16 sps:$4 sm:$0xff]  }
 0x218   :  { %2676 = vmatprep.subr.bf16.mxu0 %v4046_v62  ;;  %2758 = vmatprep.subr.bf16.mxu1 %v4049_v63  ;;  %v4103_v62 = vld [vmem:[#allocation11 + $0x22c] ss:$16 sps:$4 sm:$0xff]  }
 0x21b   :  { %2677 = vmatpush1.bf16.msra.mxu0 %v4044_v0  ;;  %2759 = vmatpush1.bf16.msra.mxu1 %v4047_v1  ;;  %v4098_v0 = vld [vmem:[#allocation11 + $0x220] ss:$16 sps:$4 sm:$0xff]   ;;  %v4101_v1 = vld [vmem:[#allocation11 + $0x228] ss:$16 sps:$4 sm:$0xff]  }
 0x21c   :  { %2678 = vmatprep.subr.bf16.mxu0 %v4052_v2  ;;  %2760 = vmatprep.subr.bf16.mxu1 %v4055_v3  ;;  %v4106_v2 = vld [vmem:[#allocation11 + $0x244] ss:$16 sps:$4 sm:$0xff]   ;;  %v4109_v3 = vld [vmem:[#allocation11 + $0x24c] ss:$16 sps:$4 sm:$0xff]  }
 0x21f   :  { %2679 = vmatpush1.bf16.msra.mxu0 %v4050_v4  ;;  %2761 = vmatpush1.bf16.msra.mxu1 %v4053_v5  ;;  %v4104_v4 = vld [vmem:[#allocation11 + $0x240] ss:$16 sps:$4 sm:$0xff]   ;;  %v4107_v5 = vld [vmem:[#allocation11 + $0x248] ss:$16 sps:$4 sm:$0xff]  }
 0x220   :  { %2680 = vmatprep.subr.bf16.mxu0 %v4058_v6  ;;  %2762 = vmatprep.subr.bf16.mxu1 %v4061_v8  ;;  %v4112_v6 = vld [vmem:[#allocation11 + $0x264] ss:$16 sps:$4 sm:$0xff]   ;;  %v4115_v8 = vld [vmem:[#allocation11 + $0x26c] ss:$16 sps:$4 sm:$0xff]  }
 0x223   :  { %2681 = vmatpush1.bf16.msra.mxu0 %v4056_v9  ;;  %2763 = vmatpush1.bf16.msra.mxu1 %v4059_v10  ;;  %v4110_v9 = vld [vmem:[#allocation11 + $0x260] ss:$16 sps:$4 sm:$0xff]   ;;  %v4113_v10 = vld [vmem:[#allocation11 + $0x268] ss:$16 sps:$4 sm:$0xff]  }
 0x224   :  { %2682 = vmatprep.subr.bf16.mxu0 %v4064_v11  ;;  %2764 = vmatprep.subr.bf16.mxu1 %v4067_v12  ;;  %v4118_v11 = vld [vmem:[#allocation11 + $0x284] ss:$16 sps:$4 sm:$0xff]   ;;  %v4121_v12 = vld [vmem:[#allocation11 + $0x28c] ss:$16 sps:$4 sm:$0xff]  }
 0x227   :  { %2683 = vmatpush1.bf16.msra.mxu0 %v4062_v13  ;;  %2765 = vmatpush1.bf16.msra.mxu1 %v4065_v14  ;;  %v4116_v13 = vld [vmem:[#allocation11 + $0x280] ss:$16 sps:$4 sm:$0xff]   ;;  %v4119_v14 = vld [vmem:[#allocation11 + $0x288] ss:$16 sps:$4 sm:$0xff]  }
 0x228   :  { %2684 = vmatprep.subr.bf16.mxu0 %v4070_v15  ;;  %2766 = vmatprep.subr.bf16.mxu1 %v4073_v16  ;;  %v4124_v15 = vld [vmem:[#allocation11 + $0x2a4] ss:$16 sps:$4 sm:$0xff]   ;;  %v4127_v16 = vld [vmem:[#allocation11 + $0x2ac] ss:$16 sps:$4 sm:$0xff]  }
 0x22b   :  { %2685 = vmatpush1.bf16.msra.mxu0 %v4068_v17  ;;  %2767 = vmatpush1.bf16.msra.mxu1 %v4071_v18  ;;  %v4122_v17 = vld [vmem:[#allocation11 + $0x2a0] ss:$16 sps:$4 sm:$0xff]   ;;  %v4125_v18 = vld [vmem:[#allocation11 + $0x2a8] ss:$16 sps:$4 sm:$0xff]  }
 0x22c   :  { %2686 = vmatprep.subr.bf16.mxu0 %v4076_v19  ;;  %2768 = vmatprep.subr.bf16.mxu1 %v4079_v20  ;;  %v4130_v19 = vld [vmem:[#allocation11 + $0x2c4] ss:$16 sps:$4 sm:$0xff]   ;;  %v4133_v20 = vld [vmem:[#allocation11 + $0x2cc] ss:$16 sps:$4 sm:$0xff]  }
 0x22f   :  { %2687 = vmatpush1.bf16.msra.mxu0 %v4074_v21  ;;  %2769 = vmatpush1.bf16.msra.mxu1 %v4077_v22  ;;  %v4128_v21 = vld [vmem:[#allocation11 + $0x2c0] ss:$16 sps:$4 sm:$0xff]   ;;  %v4131_v22 = vld [vmem:[#allocation11 + $0x2c8] ss:$16 sps:$4 sm:$0xff]  }
 0x230   :  { %2688 = vmatprep.subr.bf16.mxu0 %v4082_v23  ;;  %2770 = vmatprep.subr.bf16.mxu1 %v4085_v24  ;;  %v4136_v23 = vld [vmem:[#allocation11 + $0x2e4] ss:$16 sps:$4 sm:$0xff]   ;;  %v4139_v24 = vld [vmem:[#allocation11 + $0x2ec] ss:$16 sps:$4 sm:$0xff]  }
 0x233   :  { %2689 = vmatpush1.bf16.msra.mxu0 %v4080_v25  ;;  %2771 = vmatpush1.bf16.msra.mxu1 %v4083_v26  ;;  %v4134_v25 = vld [vmem:[#allocation11 + $0x2e0] ss:$16 sps:$4 sm:$0xff]   ;;  %v4137_v26 = vld [vmem:[#allocation11 + $0x2e8] ss:$16 sps:$4 sm:$0xff]  }
 0x234   :  { %2690 = vmatprep.subr.bf16.mxu0 %v4088_v27  ;;  %2772 = vmatprep.subr.bf16.mxu1 %v4091_v28  ;;  %v4142_v27 = vld [vmem:[#allocation11 + $0x304] ss:$16 sps:$4 sm:$0xff]   ;;  %v4145_v28 = vld [vmem:[#allocation11 + $0x30c] ss:$16 sps:$4 sm:$0xff]  }
 0x237   :  { %2691 = vmatpush1.bf16.msra.mxu0 %v4086_v29  ;;  %2773 = vmatpush1.bf16.msra.mxu1 %v4089_v30  ;;  %v4140_v29 = vld [vmem:[#allocation11 + $0x300] ss:$16 sps:$4 sm:$0xff]   ;;  %v4143_v30 = vld [vmem:[#allocation11 + $0x308] ss:$16 sps:$4 sm:$0xff]  }
 0x238   :  { %2701 = vmatprep.subr.bf16.mxu0 %v4094_v31  ;;  %2783 = vmatprep.subr.bf16.mxu1 %v4097_v32  ;;  %v4148_v31 = vld [vmem:[#allocation11 + $0x324] ss:$16 sps:$4 sm:$0xff]   ;;  %v4151_v32 = vld [vmem:[#allocation11 + $0x32c] ss:$16 sps:$4 sm:$0xff]  }
 0x2cd   :  { %v1765_v7 = vpop.f32.mrb[8].mxu0  ;;  %v4606_v37 = vpop.f32.mrb[8].mxu1 }
 0x2ce   :  { %v3631_v38 = vadd.f32 %v1765_v7, %v1033_v34  ;;  %v1767_v39 = vpop.f32.mrb[9].mxu0  ;;  %v1849_v40 = vpop.f32.mrb[9].mxu1  ;;  %v4146_v34 = vld [vmem:[#allocation11 + $0x320] ss:$16 sps:$4 sm:$0xff]   ;;  %v4157_v7 = vld [vmem:[#allocation11 + $0x34c] ss:$16 sps:$4 sm:$0xff]  }
 0x2cf   :  { %v3632_v41 = vadd.f32 %v1767_v39, %v1037_v35  ;;  %v3634_v42 = vadd.f32 %v1849_v40, %v1045_v36  ;;  %v1769_v43 = vpop.f32.mrb[10].mxu0  ;;  %v1851_v44 = vpop.f32.mrb[10].mxu1  ;;  %v4149_v35 = vld [vmem:[#allocation11 + $0x328] ss:$16 sps:$4 sm:$0xff]   ;;  %v4154_v36 = vld [vmem:[#allocation11 + $0x344] ss:$16 sps:$4 sm:$0xff]  }
 0x2d0   :  { %vm1854_vm6 = vcmp.gt.f32.partialorder %v3631_v38, 0.0  ;;  %v1858_v45 = vmul.f32 0.2, %v3631_v38  ;;  %v1770_v49 = vpop.f32.mrb[11].mxu0  ;;  %v1852_v50 = vpop.f32.mrb[11].mxu1 }
 0x2d1   :  { %vm1855_vm7 = vcmp.gt.f32.partialorder %v3632_v41, 0.0  ;;  %v1859_v46 = vmul.f32 0.2, %v3632_v41  ;;  %vm1857_vm8 = vcmp.gt.f32.partialorder %v3634_v42, 0.0  ;;  %v1861_v47 = vmul.f32 0.2, %v3634_v42 }
 0x2d2   :  { %v1862_v48 = vsel %vm1854_vm6, %v3631_v38, %v1858_v45  ;;  %v4152_v38 = vld [vmem:[#allocation11 + $0x340] ss:$16 sps:$4 sm:$0xff]   ;;  %v4155_v39 = vld [vmem:[#allocation11 + $0x348] ss:$16 sps:$4 sm:$0xff]   ;;  %v4160_v40 = vld [vmem:[#allocation11 + $0x364] ss:$16 sps:$4 sm:$0xff]   ;;  %v1041_v50 = vrot.slane %v4598_v33, %v4577_v52 }
 0x2d3   :  { %v1863_v53 = vsel %vm1855_vm7, %v3632_v41, %v1859_v46  ;;  %v1865_v59 = vsel %vm1857_vm8, %v3634_v42, %v1861_v47  ;;  %v1866_v60 = vpack.c.bf16 %v1862_v48, %v1862_v48  ;;  %v4163_v41 = vld [vmem:[#allocation11 + $0x36c] ss:$16 sps:$4 sm:$0xff]   ;;  %v4158_v42 = vld [vmem:[#allocation11 + $0x360] ss:$16 sps:$4 sm:$0xff]   ;;  %v4161_v43 = vld [vmem:[#allocation11 + $0x368] ss:$16 sps:$4 sm:$0xff]  }
 0x2d4   :  { %v1867_v56 = vpack.c.bf16 %v1863_v53, %v1863_v53  ;;  %v1869_v63 = vpack.c.bf16 %v1865_v59, %v1865_v59  ;;  %v4166_v44 = vld [vmem:[#allocation11 + $0x384] ss:$16 sps:$4 sm:$0xff]   ;;  %v4169_v45 = vld [vmem:[#allocation11 + $0x38c] ss:$16 sps:$4 sm:$0xff]   ;;  %v4164_v46 = vld [vmem:[#allocation11 + $0x380] ss:$16 sps:$4 sm:$0xff]   ;;  %v3633_v59 = vadd.f32 %v4606_v37, %v1041_v50 }
 0x2d5   :  { %v4167_v47 = vld [vmem:[#allocation11 + $0x388] ss:$16 sps:$4 sm:$0xff]   ;;  %v4172_v48 = vld [vmem:[#allocation11 + $0x3a4] ss:$16 sps:$4 sm:$0xff]   ;;  %v4175_v49 = vld [vmem:[#allocation11 + $0x3ac] ss:$16 sps:$4 sm:$0xff]  }
 0x2d6   :  { %2692 = vmatprep.mubr.bf16.mxu0 %v1867_v56  ;;  %2774 = vmatprep.mubr.bf16.mxu1 %v1867_v56  ;;  %v4170_v53 = vld [vmem:[#allocation11 + $0x3a0] ss:$16 sps:$4 sm:$0xff]   ;;  %v4173_v56 = vld [vmem:[#allocation11 + $0x3a8] ss:$16 sps:$4 sm:$0xff]   ;;  %vm1856_vm9 = vcmp.gt.f32.partialorder %v3633_v59, 0.0 }
 0x2d7   :  { %2693 = vmatmul.mubr.bf16.vlgmr.msra.gmra.mrb[12].mxu0 %v1866_v60  ;;  %2775 = vmatmul.mubr.bf16.vlgmr.msra.gmra.mrb[12].mxu1 %v1866_v60  ;;  %v4176_v60 = vld [vmem:[#allocation11 + $0x3c0] ss:$16 sps:$4 sm:$0xff]  }
 0x2d8   :  { %2702 = vmatpush1.bf16.msra.mxu0 %v4092_v57  ;;  %2784 = vmatpush1.bf16.msra.mxu1 %v4095_v58  ;;  %v4178_v57 = vld [vmem:[#allocation11 + $0x3c4] ss:$16 sps:$4 sm:$0xff]   ;;  %v4181_v58 = vld [vmem:[#allocation11 + $0x3cc] ss:$16 sps:$4 sm:$0xff]   ;;  %v4182_v33 = vld [vmem:[#allocation11 + $0x3e0] ss:$16 sps:$4 sm:$0xff]  }
 0x2d9   :  { %2733 = vmatprep.mubr.bf16.mxu0 %v1869_v63  ;;  %2815 = vmatprep.mubr.bf16.mxu1 %v1869_v63  ;;  %v4187_v63 = vld [vmem:[#allocation11 + $0x3ec] ss:$16 sps:$4 sm:$0xff]   ;;  %v4190_v37 = vld [vmem:[#allocation13] sm:$0xff]  }
 0x2da   :  { %2703 = vmatprep.subr.bf16.mxu0 %v4100_v61  ;;  %2785 = vmatprep.subr.bf16.mxu1 %v4103_v62  ;;  %v4179_v61 = vld [vmem:[#allocation11 + $0x3c8] ss:$16 sps:$4 sm:$0xff]   ;;  %v4184_v62 = vld [vmem:[#allocation11 + $0x3e4] ss:$16 sps:$4 sm:$0xff]  }
 0x2dc   :  { %2704 = vmatpush1.bf16.msra.mxu0 %v4098_v0  ;;  %2786 = vmatpush1.bf16.msra.mxu1 %v4101_v1  ;;  %v1860_v0 = vmul.f32 0.2, %v3633_v59  ;;  %v4185_v1 = vld [vmem:[#allocation11 + $0x3e8] ss:$16 sps:$4 sm:$0xff]  }
 0x2dd   :  { %2705 = vmatprep.subr.bf16.mxu0 %v4106_v2  ;;  %2787 = vmatprep.subr.bf16.mxu1 %v4109_v3  ;;  %v4188_v2 = vld [vmem:[#allocation13 + $0x40] sm:$0xff]  }
 0x2de   :  { %v4189_v3 = vld [vmem:[#allocation13 + $0xc0] sm:$0xff]  }
 0x2e0   :  { %2706 = vmatpush1.bf16.msra.mxu0 %v4104_v4  ;;  %2788 = vmatpush1.bf16.msra.mxu1 %v4107_v5  ;;  %v1864_v4 = vsel %vm1856_vm9, %v3633_v59, %v1860_v0  ;;  %v4191_v5 = vld [vmem:[#allocation13 + $0x80] sm:$0xff]  }
 0x2e1   :  { %2707 = vmatprep.subr.bf16.mxu0 %v4112_v6  ;;  %2789 = vmatprep.subr.bf16.mxu1 %v4115_v8  ;;  %v1868_v6 = vpack.c.bf16 %v1864_v4, %v1864_v4  ;;  %v4192_v8 = vld [vmem:[#allocation13 + $0x48] sm:$0xff]  }
 0x2e4   :  { %2708 = vmatpush1.bf16.msra.mxu0 %v4110_v9  ;;  %2790 = vmatpush1.bf16.msra.mxu1 %v4113_v10  ;;  %v4193_v9 = vld [vmem:[#allocation13 + $0xc8] sm:$0xff]  }
 0x2e5   :  { %2709 = vmatprep.subr.bf16.mxu0 %v4118_v11  ;;  %2791 = vmatprep.subr.bf16.mxu1 %v4121_v12  ;;  %v4194_v10 = vld [vmem:[#allocation13 + $0x8] sm:$0xff]   ;;  %v4196_v12 = vld [vmem:[#allocation13 + $0x50] sm:$0xff]  }
 0x2e6   :  { %v4195_v11 = vld [vmem:[#allocation13 + $0x88] sm:$0xff]  }
 0x2e8   :  { %2710 = vmatpush1.bf16.msra.mxu0 %v4116_v13  ;;  %2792 = vmatpush1.bf16.msra.mxu1 %v4119_v14  ;;  %v4197_v13 = vld [vmem:[#allocation13 + $0xd0] sm:$0xff]  }
 0x2e9   :  { %2711 = vmatprep.subr.bf16.mxu0 %v4124_v15  ;;  %2793 = vmatprep.subr.bf16.mxu1 %v4127_v16  ;;  %v4198_v14 = vld [vmem:[#allocation13 + $0x10] sm:$0xff]   ;;  %v4200_v16 = vld [vmem:[#allocation13 + $0x58] sm:$0xff]  }
 0x2ea   :  { %v4199_v15 = vld [vmem:[#allocation13 + $0x90] sm:$0xff]  }
 0x2ec   :  { %2712 = vmatpush1.bf16.msra.mxu0 %v4122_v17  ;;  %2794 = vmatpush1.bf16.msra.mxu1 %v4125_v18  ;;  %v4201_v17 = vld [vmem:[#allocation13 + $0xd8] sm:$0xff]  }
 0x2ed   :  { %2713 = vmatprep.subr.bf16.mxu0 %v4130_v19  ;;  %2795 = vmatprep.subr.bf16.mxu1 %v4133_v20  ;;  %v4202_v18 = vld [vmem:[#allocation13 + $0x18] sm:$0xff]   ;;  %v4204_v20 = vld [vmem:[#allocation13 + $0x60] sm:$0xff]  }
 0x2ee   :  { %v4203_v19 = vld [vmem:[#allocation13 + $0x98] sm:$0xff]  }
 0x2f0   :  { %2714 = vmatpush1.bf16.msra.mxu0 %v4128_v21  ;;  %2796 = vmatpush1.bf16.msra.mxu1 %v4131_v22  ;;  %v4205_v21 = vld [vmem:[#allocation13 + $0xe0] sm:$0xff]  }
 0x2f1   :  { %2715 = vmatprep.subr.bf16.mxu0 %v4136_v23  ;;  %2797 = vmatprep.subr.bf16.mxu1 %v4139_v24  ;;  %v4206_v22 = vld [vmem:[#allocation13 + $0x20] sm:$0xff]   ;;  %v4208_v24 = vld [vmem:[#allocation13 + $0x68] sm:$0xff]  }
 0x2f2   :  { %v4207_v23 = vld [vmem:[#allocation13 + $0xa0] sm:$0xff]  }
 0x2f4   :  { %2716 = vmatpush1.bf16.msra.mxu0 %v4134_v25  ;;  %2798 = vmatpush1.bf16.msra.mxu1 %v4137_v26  ;;  %v4209_v25 = vld [vmem:[#allocation13 + $0xe8] sm:$0xff]  }
 0x2f5   :  { %2717 = vmatprep.subr.bf16.mxu0 %v4142_v27  ;;  %2799 = vmatprep.subr.bf16.mxu1 %v4145_v28  ;;  %v4210_v26 = vld [vmem:[#allocation13 + $0x28] sm:$0xff]   ;;  %v4212_v28 = vld [vmem:[#allocation13 + $0x70] sm:$0xff]  }
 0x2f6   :  { %v4211_v27 = vld [vmem:[#allocation13 + $0xa8] sm:$0xff]  }
 0x2f8   :  { %2718 = vmatpush1.bf16.msra.mxu0 %v4140_v29  ;;  %2800 = vmatpush1.bf16.msra.mxu1 %v4143_v30  ;;  %v4213_v29 = vld [vmem:[#allocation13 + $0xf0] sm:$0xff]  }
 0x2f9   :  { %2719 = vmatprep.subr.bf16.mxu0 %v4148_v31  ;;  %2801 = vmatprep.subr.bf16.mxu1 %v4151_v32  ;;  %v4214_v30 = vld [vmem:[#allocation13 + $0x30] sm:$0xff]   ;;  %v4216_v32 = vld [vmem:[#allocation13 + $0x78] sm:$0xff]  }
 0x2fa   :  { %v4215_v31 = vld [vmem:[#allocation13 + $0xb0] sm:$0xff]  }
 0x2fc   :  { %2720 = vmatpush1.bf16.msra.mxu0 %v4146_v34  ;;  %2802 = vmatpush1.bf16.msra.mxu1 %v4149_v35  ;;  %v4217_v34 = vld [vmem:[#allocation13 + $0xf8] sm:$0xff]  }
 0x2fd   :  { %2721 = vmatprep.subr.bf16.mxu0 %v4154_v36  ;;  %2803 = vmatprep.subr.bf16.mxu1 %v4157_v7  ;;  %v4218_v35 = vld [vmem:[#allocation13 + $0x38] sm:$0xff]  }
 0x2fe   :  { %v4219_v36 = vld [vmem:[#allocation13 + $0xb8] sm:$0xff]  }
 0x2ff   :  { %v1998_v7 = vld [vmem:[%s4641_s8] sm:$0xf] }
 0x300   :  { %2722 = vmatpush1.bf16.msra.mxu0 %v4152_v38  ;;  %2804 = vmatpush1.bf16.msra.mxu1 %v4155_v39  ;;  %v2003_v38 = vrot.slane %v1998_v7, %v4575_v51  ;;  %v2011_v39 = vrot.slane %v1998_v7, %v4577_v52 }
 0x301   :  { %2723 = vmatprep.subr.bf16.mxu0 %v4160_v40  ;;  %2805 = vmatprep.subr.bf16.mxu1 %v4163_v41  ;;  %v2007_v40 = vrot.slane %v1998_v7, %v4582_v54  ;;  %v2015_v41 = vrot.slane %v1998_v7, %v4584_v55 }
 0x304   :  { %2724 = vmatpush1.bf16.msra.mxu0 %v4158_v42  ;;  %2806 = vmatpush1.bf16.msra.mxu1 %v4161_v43 }
 0x305   :  { %2725 = vmatprep.subr.bf16.mxu0 %v4166_v44  ;;  %2807 = vmatprep.subr.bf16.mxu1 %v4169_v45 }
 0x308   :  { %2726 = vmatpush1.bf16.msra.mxu0 %v4164_v46  ;;  %2808 = vmatpush1.bf16.msra.mxu1 %v4167_v47 }
 0x309   :  { %2727 = vmatprep.subr.bf16.mxu0 %v4172_v48  ;;  %2809 = vmatprep.subr.bf16.mxu1 %v4175_v49 }
 0x30c   :  { %2728 = vmatpush1.bf16.msra.mxu0 %v4170_v53  ;;  %2810 = vmatpush1.bf16.msra.mxu1 %v4173_v56 }
 0x30d   :  { %2729 = vmatprep.subr.bf16.mxu0 %v4178_v57  ;;  %2811 = vmatprep.subr.bf16.mxu1 %v4181_v58 }
 0x310   :  { %2730 = vmatpush1.bf16.msra.mxu0 %v4176_v60  ;;  %2812 = vmatpush1.bf16.msra.mxu1 %v4179_v61 }
 0x311   :  { %2731 = vmatprep.subr.bf16.mxu0 %v4184_v62  ;;  %2813 = vmatprep.subr.bf16.mxu1 %v4187_v63 }
 0x314   :  { %2732 = vmatpush1.bf16.msra.mxu0 %v4182_v33  ;;  %2814 = vmatpush1.bf16.msra.mxu1 %v4185_v1 }
 0x315   :  { %3587 = vmatprep.subr.bf16.mxu0 %v4188_v2  ;;  %3609 = vmatprep.subr.bf16.mxu1 %v4189_v3  ;;  %v3554_v3 = vld [vmem:[%s4643_s10] ss:$0 sm:$0xff] }
 0x317   :  { %2734 = vmatmul.mubr.bf16.vlgmr.msra.gmra.mrb[12].mxu0 %v1868_v6  ;;  %2816 = vmatmul.mubr.bf16.vlgmr.msra.gmra.mrb[12].mxu1 %v1868_v6 }
 0x318   :  { %3588 = vmatpush3.bf16.msra.mxu0 %v4190_v37  ;;  %3610 = vmatpush3.bf16.msra.mxu1 %v4191_v5 }
 0x319   :  { %3589 = vmatprep.subr.bf16.mxu0 %v4192_v8  ;;  %3611 = vmatprep.subr.bf16.mxu1 %v4193_v9 }
 0x31c   :  { %3590 = vmatpush3.bf16.msra.mxu0 %v4194_v10  ;;  %3612 = vmatpush3.bf16.msra.mxu1 %v4195_v11 }
 0x31d   :  { %3591 = vmatprep.subr.bf16.mxu0 %v4196_v12  ;;  %3613 = vmatprep.subr.bf16.mxu1 %v4197_v13 }
 0x320   :  { %3592 = vmatpush3.bf16.msra.mxu0 %v4198_v14  ;;  %3614 = vmatpush3.bf16.msra.mxu1 %v4199_v15 }
 0x321   :  { %3593 = vmatprep.subr.bf16.mxu0 %v4200_v16  ;;  %3615 = vmatprep.subr.bf16.mxu1 %v4201_v17 }
 0x324   :  { %3594 = vmatpush3.bf16.msra.mxu0 %v4202_v18  ;;  %3616 = vmatpush3.bf16.msra.mxu1 %v4203_v19 }
 0x325   :  { %3595 = vmatprep.subr.bf16.mxu0 %v4204_v20  ;;  %3617 = vmatprep.subr.bf16.mxu1 %v4205_v21 }
 0x328   :  { %3596 = vmatpush3.bf16.msra.mxu0 %v4206_v22  ;;  %3618 = vmatpush3.bf16.msra.mxu1 %v4207_v23 }
 0x329   :  { %3597 = vmatprep.subr.bf16.mxu0 %v4208_v24  ;;  %3619 = vmatprep.subr.bf16.mxu1 %v4209_v25 }
 0x32c   :  { %3598 = vmatpush3.bf16.msra.mxu0 %v4210_v26  ;;  %3620 = vmatpush3.bf16.msra.mxu1 %v4211_v27 }
 0x32d   :  { %3599 = vmatprep.subr.bf16.mxu0 %v4212_v28  ;;  %3621 = vmatprep.subr.bf16.mxu1 %v4213_v29 }
 0x330   :  { %3600 = vmatpush3.bf16.msra.mxu0 %v4214_v30  ;;  %3622 = vmatpush3.bf16.msra.mxu1 %v4215_v31 }
 0x331   :  { %3601 = vmatprep.subr.bf16.mxu0 %v4216_v32  ;;  %3623 = vmatprep.subr.bf16.mxu1 %v4217_v34 }
 0x334   :  { %3602 = vmatpush3.bf16.msra.mxu0 %v4218_v35  ;;  %3624 = vmatpush3.bf16.msra.mxu1 %v4219_v36 }
 0x3ea   :  { %v2735_v42 = vpop.f32.mrb[12].mxu0  ;;  %v2817_v43 = vpop.f32.mrb[12].mxu1 }
 0x3eb   :  { %v3635_v44 = vadd.f32 %v2735_v42, %v2003_v38  ;;  %v3637_v45 = vadd.f32 %v2817_v43, %v2011_v39  ;;  %v2737_v46 = vpop.f32.mrb[13].mxu0  ;;  %v2819_v47 = vpop.f32.mrb[13].mxu1 }
 0x3ec   :  { %v3636_v48 = vadd.f32 %v2737_v46, %v2007_v40  ;;  %v3638_v49 = vadd.f32 %v2819_v47, %v2015_v41  ;;  %v2739_v50 = vpop.f32.mrb[14].mxu0  ;;  %v2821_v53 = vpop.f32.mrb[14].mxu1 }
 0x3ed   :  { %vm2824_vm10 = vcmp.gt.f32.partialorder %v3635_v44, 0.0  ;;  %v2828_v56 = vmul.f32 0.2, %v3635_v44  ;;  %vm2826_vm11 = vcmp.gt.f32.partialorder %v3637_v45, 0.0  ;;  %v2830_v51 = vmul.f32 0.2, %v3637_v45 }
 0x3ee   :  { %vm2825_vm12 = vcmp.gt.f32.partialorder %v3636_v48, 0.0  ;;  %v2829_v52 = vmul.f32 0.2, %v3636_v48  ;;  %vm2827_vm13 = vcmp.gt.f32.partialorder %v3638_v49, 0.0  ;;  %v2831_v54 = vmul.f32 0.2, %v3638_v49 }
 0x3ef   :  { %v2832_v57 = vsel %vm2824_vm10, %v3635_v44, %v2828_v56  ;;  %v2834_v55 = vsel %vm2826_vm11, %v3637_v45, %v2830_v51  ;;  %v2740_v58 = vpop.f32.mrb[15].mxu0  ;;  %v2822_v59 = vpop.f32.mrb[15].mxu1 }
 0x3f0   :  { %v2833_v60 = vsel %vm2825_vm12, %v3636_v48, %v2829_v52  ;;  %v2835_v61 = vsel %vm2827_vm13, %v3638_v49, %v2831_v54  ;;  %v2836_v0 = vpack.c.bf16 %v2832_v57, %v2832_v57  ;;  %v2838_v33 = vpack.c.bf16 %v2834_v55, %v2834_v55 }
 0x3f1   :  { %v2837_v62 = vpack.c.bf16 %v2833_v60, %v2833_v60  ;;  %v2839_v63 = vpack.c.bf16 %v2835_v61, %v2835_v61 }
 0x3f3   :  { %3135 = vmatprep.mubr.bf16.mxu0 %v2837_v62  ;;  %3175 = vmatprep.mubr.bf16.mxu1 %v2839_v63 }
 0x3f4   :  { %3136 = vmatmul.mubr.bf16.vlgmr.msra.gmra.mrb[16].mxu0 %v2836_v0  ;;  %3176 = vmatmul.mubr.bf16.vlgmr.msra.gmra.mrb[16].mxu1 %v2838_v33 }
 0x4c7   :  { %v3603_v1 = vpop.f32.mrb[16].mxu0  ;;  %v3625_v2 = vpop.f32.mrb[16].mxu1 }
 0x4c8   :  { %v3604_v4 = vpop.f32.mrb[17].mxu0  ;;  %v3626_v37 = vpop.f32.mrb[17].mxu1 }
 0x4c9   :  { %v3605_v5 = vadd.f32 %v3604_v4, %v3603_v1  ;;  %v3627_v6 = vadd.f32 %v3626_v37, %v3625_v2  ;;  %v3606_v8 = vpop.f32.mrb[18].mxu0  ;;  %v3628_v9 = vpop.f32.mrb[18].mxu1 }
 0x4ca   :  { %v3607_v10 = vpop.f32.mrb[19].mxu0  ;;  %v3629_v11 = vpop.f32.mrb[19].mxu1 }
 0x4cb   :  { %v3138_v12 = vadd.f32 %v3605_v5, %v3554_v3 }
 0x4cd   :  { %v3178_v13 = vadd.f32 %v3627_v6, %v3138_v12 }
 0x4cf   :  { %3183 = vst [vmem:[#allocation14] sm:$0xff] %v3178_v13 }
 0x4d0   :  { %4385 = shalt.err (!%p4382_p4)
}
 0x4d1   :  { %s4386_s28 = scalar_lea.hbm %s4644_s11, 128 }
 0x4d2   :  { %p4387_p5 = scmp.ne.s32.totalorder %s4644_s11, %s4386_s28  ;;  %p4390_p6 = scmp.lt.u32.totalorder %s4386_s28, %s4644_s11 }
 0x4d4   :  { %p4392_p7 = pnand %p4390_p6, %p4387_p5 }
 0x4d6   :  { %4395 = shalt.err (!%p4392_p7)
}
 0x4d7   :  { %3193 = dma.vmem_to_hbm [thread:$0]  %s3191_s27, 128, %s4644_s11, [#allocation4]  }
 0x4d8   :  { %4404 = dma.done.wait [#allocation4], 128  }
 0x4d9   :  { %4405 = vsyncadd [#allocation4], 4294967168 }
 0x4da   :  { %3197 = vsyncpa [#allocation3], 1 }
 0x4db   :  { %3198 = vsyncpa [#allocation6], 1 }
 0x4dc   :  { %3199 = vsyncpa [#allocation9], 1 }
 0x4dd   :  { %3200 = vsyncpa [#allocation12], 1 }
 0x4de   :  { %3201 = vsyncpa [#allocation4], 1 }

</bundles_post_ra>
